<compile_context>
chip_gen: v7x
topology: tpu7x:2x2x1
jax: 0.10.0
libtpu: 0.0.40
codegen_flags: <defaults>
</compile_context>

<pallas_src>
import functools

import jax
import jax.numpy as jnp
import numpy as np
from jax import lax
from jax.experimental import pallas as pl
from jax.experimental.pallas import tpu as pltpu


# --------------------------------------------------------------------------
# Single fused kernel: conditioning + modulated LN + batch-axis self-attention
# + residual + modulated LN + GELU MLP + residual.
# --------------------------------------------------------------------------
def dit_decoder_kernel(cond_ref, t_ref, x_ref,
                       wmod_ref, bmod_ref,
                       g1_ref, be1_ref, g2_ref, be2_ref,
                       wqkv_ref, bqkv_ref, wo_ref, bo_ref,
                       w1_ref, b1_ref, w2_ref, b2_ref,
                       out_ref, *, nhead):
    B, D = t_ref.shape
    TB = x_ref.shape[0]
    T = TB // B
    dh = D // nhead
    eps = 1e-5
    inv_sqrt_dh = 1.0 / float(np.sqrt(dh))

    def mm_t(a, w):          # a:(m,k), w:(n,k) -> a @ w^T : (m,n)   (MXU)
        return lax.dot_general(a, w, (((1,), (1,)), ((), ())),
                               preferred_element_type=jnp.float32)

    def layer_norm(v, g_ref, b_ref):
        mu = jnp.mean(v, axis=-1, keepdims=True)
        var = jnp.mean(jnp.square(v - mu), axis=-1, keepdims=True)
        return (v - mu) * lax.rsqrt(var + eps) * g_ref[...] + b_ref[...]

    # ---- conditioning: c = SiLU(mean(cond, 0) + t); all six modulation heads in one GEMM
    c = jnp.mean(cond_ref[...], axis=0) + t_ref[...]            # (B, D)
    c = c * jax.nn.sigmoid(c)                                   # SiLU
    mods = mm_t(c, wmod_ref[...]) + bmod_ref[...]               # (B, 6D)
    mods = jnp.tile(mods, (T, 1))                               # (T*B, 6D); row r -> batch r % B
    scale1 = mods[:, 0 * D:1 * D]                               # attn_mod1.scale
    shift1 = mods[:, 1 * D:2 * D]                               # attn_mod1.shift
    scale2 = mods[:, 2 * D:3 * D]                               # attn_mod2.scale
    scale3 = mods[:, 3 * D:4 * D]                               # mlp_mod1.scale
    shift3 = mods[:, 4 * D:5 * D]                               # mlp_mod1.shift
    scale4 = mods[:, 5 * D:6 * D]                               # mlp_mod2.scale

    x2d = x_ref[...]                                            # (T*B, D), row r = (t=r//B, b=r%B)

    # ---- self-attention branch (attention over the batch axis, per token) -------
    h1 = layer_norm(x2d, g1_ref, be1_ref) * scale1 + shift1     # norm1 + attn_mod1
    qkv = mm_t(h1, wqkv_ref[...]) + bqkv_ref[...]               # fused QKV: (T*B, 3D)
    qkv3 = qkv.reshape(T, B, 3 * D)

    o_heads = []
    for h in range(nhead):                                      # static unroll (nhead small)
        q_h = qkv3[:, :, h * dh:(h + 1) * dh] * inv_sqrt_dh             # (T, B, dh), q-only scaling
        k_h = qkv3[:, :, D + h * dh:D + (h + 1) * dh]
        v_h = qkv3[:, :, 2 * D + h * dh:2 * D + (h + 1) * dh]
        s = jnp.einsum('tbe,tce->tbc', q_h, k_h,
                       preferred_element_type=jnp.float32)              # (T, B, B) scores
        s = s - jnp.max(s, axis=-1, keepdims=True)
        p = jnp.exp(s)
        p = p * pl.reciprocal(jnp.sum(p, axis=-1, keepdims=True), approx=True)
        o_heads.append(jnp.einsum('tbc,tce->tbe', p, v_h,
                                  preferred_element_type=jnp.float32))  # (T, B, dh)
    o3 = jnp.concatenate(o_heads, axis=-1)                      # (T, B, D)
    attn = mm_t(o3.reshape(TB, D), wo_ref[...]) + bo_ref[...]   # single output projection

    xr = attn * scale2 + x2d                                    # attn_mod2 (dropout=id) + residual

    # (norm3 / cross_attn branch: result overwritten before use in PyTorch -> omitted)

    # ---- MLP branch --------------------------------------------------------------
    h2 = layer_norm(xr, g2_ref, be2_ref) * scale3 + shift3      # norm2 + mlp_mod1
    h2 = mm_t(h2, w1_ref[...]) + b1_ref[...]                    # linear1
    h2 = 0.5 * h2 * (1.0 + jnp.tanh(0.7978845608028654 *
                                    (h2 + 0.044715 * h2 * h2 * h2)))    # GELU(tanh)
    h2 = mm_t(h2, w2_ref[...]) + b2_ref[...]                    # linear2
    out_ref[...] = (xr + h2 * scale4).astype(out_ref.dtype)     # mlp_mod2 + residual


# --------------------------------------------------------------------------
# Wrapper
# --------------------------------------------------------------------------
def dit_decoder_forward(x, t, cond, p, nhead):
    T, B, D = x.shape
    x2d = x.reshape(T * B, D)                                   # free layout change in XLA

    # Stack the six modulation Linear(d, d) heads into one (6D, D) weight / (1, 6D) bias.
    wmod = jnp.concatenate([p["ws1"], p["wsh1"], p["ws2"],
                            p["ws3"], p["wsh3"], p["ws4"]], axis=0)
    bmod = jnp.concatenate([p["bs1"], p["bsh1"], p["bs2"],
                            p["bs3"], p["bsh3"], p["bs4"]], axis=1)

    args = (cond, t, x2d, wmod, bmod,
            p["g1"], p["be1"], p["g2"], p["be2"],
            p["wqkv"], p["bqkv"], p["wo"], p["bo"],
            p["w1"], p["b1"], p["w2"], p["b2"])

    vmem = pl.BlockSpec(memory_space=pltpu.MemorySpace.VMEM)
    out2d = pl.pallas_call(
        functools.partial(dit_decoder_kernel, nhead=nhead),
        out_shape=jax.ShapeDtypeStruct((T * B, D), jnp.float32),
        in_specs=[vmem] * len(args),
        out_specs=vmem,
        # Everything (weights + activations) fits VMEM by orders of magnitude at these
        # sizes.  At production D/DFF/B, re-tile with a grid and set
        # pltpu.CompilerParams(vmem_limit_bytes=...) (v7x has 64 MiB physical VMEM).
    )(*args)
    return out2d.reshape(T, B, D)


# --------------------------------------------------------------------------
# Pure-JAX reference mirroring the PyTorch forward (eval mode).
# --------------------------------------------------------------------------
def reference_forward(x, t, cond, p, nhead):
    T, B, D = x.shape
    dh = D // nhead

    def lin(v, w, b):
        return v @ w.T + b[0]

    def ln(v, g, be):
        mu = v.mean(-1, keepdims=True)
        var = ((v - mu) ** 2).mean(-1, keepdims=True)
        return (v - mu) / jnp.sqrt(var + 1e-5) * g[0] + be[0]

    def gelu_tanh(v):
        return 0.5 * v * (1.0 + jnp.tanh(jnp.sqrt(2.0 / jnp.pi) *
                                         (v + 0.044715 * v ** 3)))

    c = jnp.mean(cond, axis=0) + t
    ca = c * jax.nn.sigmoid(c)
    scale1 = lin(ca, p["ws1"], p["bs1"]); shift1 = lin(ca, p["wsh1"], p["bsh1"])
    scale2 = lin(ca, p["ws2"], p["bs2"])
    scale3 = lin(ca, p["ws3"], p["bs3"]); shift3 = lin(ca, p["wsh3"], p["bsh3"])
    scale4 = lin(ca, p["ws4"], p["bs4"])

    def mha(y, wqkv, bqkv, wo, bo):           # y: (L, N, E), seq-first like torch
        L, N, E = y.shape
        qkv = y @ wqkv.T + bqkv[0]
        q, k, v = jnp.split(qkv, 3, axis=-1)

        def split_heads(z):
            return jnp.transpose(z.reshape(L, N * nhead, dh), (1, 0, 2))

        qh, kh, vh = map(split_heads, (q, k, v))
        s = (qh / jnp.sqrt(float(dh))) @ jnp.transpose(kh, (0, 2, 1))
        pa = jax.nn.softmax(s, axis=-1)
        o = pa @ vh
        o = jnp.transpose(o, (1, 0, 2)).reshape(L, N, E)
        return o @ wo.T + bo[0]

    x2 = ln(x, p["g1"], p["be1"]) * scale1[None] + shift1[None]
    x2 = jnp.transpose(x2, (1, 0, 2))
    x2 = mha(x2, p["wqkv"], p["bqkv"], p["wo"], p["bo"])
    x2 = jnp.transpose(x2, (1, 0, 2))
    xr = x2 * scale2[None] + x
    # (norm3 / cross_attn branch: result overwritten before use in the PyTorch code)
    x2 = ln(xr, p["g2"], p["be2"]) * scale3[None] + shift3[None]
    x2 = gelu_tanh(x2 @ p["w1"].T + p["b1"][0]) @ p["w2"].T + p["b2"][0]
    x2 = x2 * scale4[None]
    return xr + x2


# --------------------------------------------------------------------------
if __name__ == "__main__":
    D, NHEAD, DFF = 32, 4, 64        # d_model, nhead, dim_feedforward
    T, B, C = 8, 2, 3                # tokens, batch, conditioning tokens

    key = jax.random.PRNGKey(0)
    ks = iter(jax.random.split(key, 32))

    def rnd(shape, s=0.1):
        return (s * jax.random.normal(next(ks), shape)).astype(jnp.float32)

    params = dict(
        g1=(1.0 + rnd((1, D), 0.05)), be1=rnd((1, D), 0.05),
        g2=(1.0 + rnd((1, D), 0.05)), be2=rnd((1, D), 0.05),
        ws1=rnd((D, D)), bs1=rnd((1, D), 0.02),
        wsh1=rnd((D, D)), bsh1=rnd((1, D), 0.02),
        ws2=rnd((D, D)), bs2=rnd((1, D), 0.02),
        ws3=rnd((D, D)), bs3=rnd((1, D), 0.02),
        wsh3=rnd((D, D)), bsh3=rnd((1, D), 0.02),
        ws4=rnd((D, D)), bs4=rnd((1, D), 0.02),
        wqkv=rnd((3 * D, D)), bqkv=rnd((1, 3 * D), 0.02),
        wo=rnd((D, D)), bo=rnd((1, D), 0.02),
        w1=rnd((DFF, D)), b1=rnd((1, DFF), 0.02),
        w2=rnd((D, DFF)), b2=rnd((1, D), 0.02),
    )

    x = jax.random.normal(next(ks), (T, B, D), jnp.float32)     # (tokens, batch, d)
    t = jax.random.normal(next(ks), (B, D), jnp.float32)        # time embedding
    cond = jax.random.normal(next(ks), (C, B, D), jnp.float32)  # conditioning tokens

    out = dit_decoder_forward(x, t, cond, params, NHEAD)
    out = jax.block_until_ready(out)

    with jax.default_matmul_precision("float32"):
        ref = reference_forward(x, t, cond, params, NHEAD)
    ref = jax.block_until_ready(ref)

    assert out.shape == (T, B, D) and out.dtype == jnp.float32
    max_err = float(jnp.max(jnp.abs(out - ref)))
    assert max_err < 3e-2, f"mismatch vs reference: max abs err = {max_err}"
    print("KERNEL_OK")
</pallas_src>

<mosaic_0001>
module attributes {stable_mosaic.version = 11 : i64} {
  func.func @dit_decoder_kernel(%arg0: memref<3x2x32xf32, #tpu.memory_space<vmem>>, %arg1: memref<2x32xf32, #tpu.memory_space<vmem>>, %arg2: memref<16x32xf32, #tpu.memory_space<vmem>>, %arg3: memref<192x32xf32, #tpu.memory_space<vmem>>, %arg4: memref<1x192xf32, #tpu.memory_space<vmem>>, %arg5: memref<1x32xf32, #tpu.memory_space<vmem>>, %arg6: memref<1x32xf32, #tpu.memory_space<vmem>>, %arg7: memref<1x32xf32, #tpu.memory_space<vmem>>, %arg8: memref<1x32xf32, #tpu.memory_space<vmem>>, %arg9: memref<96x32xf32, #tpu.memory_space<vmem>>, %arg10: memref<1x96xf32, #tpu.memory_space<vmem>>, %arg11: memref<32x32xf32, #tpu.memory_space<vmem>>, %arg12: memref<1x32xf32, #tpu.memory_space<vmem>>, %arg13: memref<64x32xf32, #tpu.memory_space<vmem>>, %arg14: memref<1x64xf32, #tpu.memory_space<vmem>>, %arg15: memref<32x64xf32, #tpu.memory_space<vmem>>, %arg16: memref<1x32xf32, #tpu.memory_space<vmem>>, %arg17: memref<16x32xf32, #tpu.memory_space<vmem>>) attributes {dimension_semantics = [], scalar_prefetch = 0 : i64, scratch_operands = 0 : i64, tpu.core_type = #tpu.core_type<tc>} {
    %c0 = arith.constant 0 : index
    %c0_0 = arith.constant 0 : index
    %c0_1 = arith.constant 0 : index
    %0 = vector.load %arg0[%c0, %c0_0, %c0_1] : memref<3x2x32xf32, #tpu.memory_space<vmem>>, vector<3x2x32xf32>
    %cst = arith.constant dense<0.000000e+00> : vector<2x32xf32>
    %1 = vector.multi_reduction <add>, %0, %cst [0] : vector<3x2x32xf32> to vector<2x32xf32>
    %cst_2 = arith.constant 3.000000e+00 : f32
    %2 = vector.broadcast %cst_2 : f32 to vector<2x32xf32>
    %3 = arith.divf %1, %2 : vector<2x32xf32>
    %c0_3 = arith.constant 0 : index
    %c0_4 = arith.constant 0 : index
    %4 = vector.load %arg1[%c0_3, %c0_4] : memref<2x32xf32, #tpu.memory_space<vmem>>, vector<2x32xf32>
    %5 = arith.addf %3, %4 : vector<2x32xf32>
    %6 = arith.negf %5 : vector<2x32xf32>
    %7 = math.exp %6 : vector<2x32xf32>
    %cst_5 = arith.constant 1.000000e+00 : f32
    %8 = vector.broadcast %cst_5 : f32 to vector<2x32xf32>
    %9 = arith.addf %8, %7 : vector<2x32xf32>
    %10 = arith.divf %8, %9 : vector<2x32xf32>
    %11 = arith.mulf %5, %10 : vector<2x32xf32>
    %c0_6 = arith.constant 0 : index
    %c0_7 = arith.constant 0 : index
    %12 = vector.load %arg3[%c0_6, %c0_7] : memref<192x32xf32, #tpu.memory_space<vmem>>, vector<192x32xf32>
    %cst_8 = arith.constant dense<0.000000e+00> : vector<2x192xf32>
    %13 = tpu.matmul %11, %12, %cst_8 {dimension_numbers = #tpu.dot_dimension_numbers<[1], [1], [0], [0], [0, 0, 1, 0], [], []>} : vector<2x32xf32>, vector<192x32xf32>, vector<2x192xf32> -> vector<2x192xf32>
    %c0_9 = arith.constant 0 : index
    %c0_10 = arith.constant 0 : index
    %14 = vector.load %arg4[%c0_9, %c0_10] : memref<1x192xf32, #tpu.memory_space<vmem>>, vector<1x192xf32>
    %15 = vector.broadcast %14 : vector<1x192xf32> to vector<2x192xf32>
    %16 = arith.addf %13, %15 : vector<2x192xf32>
    %17 = tpu.concatenate %16, %16, %16, %16, %16, %16, %16, %16 in 0 : vector<2x192xf32>, vector<2x192xf32>, vector<2x192xf32>, vector<2x192xf32>, vector<2x192xf32>, vector<2x192xf32>, vector<2x192xf32>, vector<2x192xf32> -> vector<16x192xf32>
    %18 = vector.extract_strided_slice %17 {offsets = [0, 0], sizes = [16, 32], strides = [1, 1]} : vector<16x192xf32> to vector<16x32xf32>
    %19 = vector.extract_strided_slice %17 {offsets = [0, 32], sizes = [16, 32], strides = [1, 1]} : vector<16x192xf32> to vector<16x32xf32>
    %20 = vector.extract_strided_slice %17 {offsets = [0, 64], sizes = [16, 32], strides = [1, 1]} : vector<16x192xf32> to vector<16x32xf32>
    %21 = vector.extract_strided_slice %17 {offsets = [0, 96], sizes = [16, 32], strides = [1, 1]} : vector<16x192xf32> to vector<16x32xf32>
    %22 = vector.extract_strided_slice %17 {offsets = [0, 128], sizes = [16, 32], strides = [1, 1]} : vector<16x192xf32> to vector<16x32xf32>
    %23 = vector.extract_strided_slice %17 {offsets = [0, 160], sizes = [16, 32], strides = [1, 1]} : vector<16x192xf32> to vector<16x32xf32>
    %c0_11 = arith.constant 0 : index
    %c0_12 = arith.constant 0 : index
    %24 = vector.load %arg2[%c0_11, %c0_12] : memref<16x32xf32, #tpu.memory_space<vmem>>, vector<16x32xf32>
    %cst_13 = arith.constant dense<0.000000e+00> : vector<16xf32>
    %25 = vector.multi_reduction <add>, %24, %cst_13 [1] : vector<16x32xf32> to vector<16xf32>
    %26 = vector.shape_cast %25 : vector<16xf32> to vector<16x1xf32>
    %cst_14 = arith.constant 3.200000e+01 : f32
    %27 = vector.broadcast %cst_14 : f32 to vector<16x1xf32>
    %28 = arith.divf %26, %27 : vector<16x1xf32>
    %29 = vector.broadcast %28 : vector<16x1xf32> to vector<16x32xf32>
    %30 = arith.subf %24, %29 : vector<16x32xf32>
    %31 = arith.mulf %30, %30 : vector<16x32xf32>
    %cst_15 = arith.constant dense<0.000000e+00> : vector<16xf32>
    %32 = vector.multi_reduction <add>, %31, %cst_15 [1] : vector<16x32xf32> to vector<16xf32>
    %33 = vector.shape_cast %32 : vector<16xf32> to vector<16x1xf32>
    %cst_16 = arith.constant 3.200000e+01 : f32
    %34 = vector.broadcast %cst_16 : f32 to vector<16x1xf32>
    %35 = arith.divf %33, %34 : vector<16x1xf32>
    %36 = vector.broadcast %28 : vector<16x1xf32> to vector<16x32xf32>
    %37 = arith.subf %24, %36 : vector<16x32xf32>
    %cst_17 = arith.constant 9.99999974E-6 : f32
    %38 = vector.broadcast %cst_17 : f32 to vector<16x1xf32>
    %39 = arith.addf %35, %38 : vector<16x1xf32>
    %40 = math.rsqrt %39 : vector<16x1xf32>
    %41 = vector.broadcast %40 : vector<16x1xf32> to vector<16x32xf32>
    %42 = arith.mulf %37, %41 : vector<16x32xf32>
    %c0_18 = arith.constant 0 : index
    %c0_19 = arith.constant 0 : index
    %43 = vector.load %arg5[%c0_18, %c0_19] : memref<1x32xf32, #tpu.memory_space<vmem>>, vector<1x32xf32>
    %44 = vector.broadcast %43 : vector<1x32xf32> to vector<16x32xf32>
    %45 = arith.mulf %42, %44 : vector<16x32xf32>
    %c0_20 = arith.constant 0 : index
    %c0_21 = arith.constant 0 : index
    %46 = vector.load %arg6[%c0_20, %c0_21] : memref<1x32xf32, #tpu.memory_space<vmem>>, vector<1x32xf32>
    %47 = vector.broadcast %46 : vector<1x32xf32> to vector<16x32xf32>
    %48 = arith.addf %45, %47 : vector<16x32xf32>
    %49 = arith.mulf %48, %18 : vector<16x32xf32>
    %50 = arith.addf %49, %19 : vector<16x32xf32>
    %c0_22 = arith.constant 0 : index
    %c0_23 = arith.constant 0 : index
    %51 = vector.load %arg9[%c0_22, %c0_23] : memref<96x32xf32, #tpu.memory_space<vmem>>, vector<96x32xf32>
    %cst_24 = arith.constant dense<0.000000e+00> : vector<16x96xf32>
    %52 = tpu.matmul %50, %51, %cst_24 {dimension_numbers = #tpu.dot_dimension_numbers<[1], [1], [0], [0], [0, 0, 1, 0], [], []>} : vector<16x32xf32>, vector<96x32xf32>, vector<16x96xf32> -> vector<16x96xf32>
    %c0_25 = arith.constant 0 : index
    %c0_26 = arith.constant 0 : index
    %53 = vector.load %arg10[%c0_25, %c0_26] : memref<1x96xf32, #tpu.memory_space<vmem>>, vector<1x96xf32>
    %54 = vector.broadcast %53 : vector<1x96xf32> to vector<16x96xf32>
    %55 = arith.addf %52, %54 : vector<16x96xf32>
    %56 = vector.shape_cast %55 : vector<16x96xf32> to vector<8x2x96xf32>
    %57 = vector.extract_strided_slice %56 {offsets = [0, 0, 0], sizes = [8, 2, 8], strides = [1, 1, 1]} : vector<8x2x96xf32> to vector<8x2x8xf32>
    %cst_27 = arith.constant 0.353553385 : f32
    %58 = vector.broadcast %cst_27 : f32 to vector<8x2x8xf32>
    %59 = arith.mulf %57, %58 : vector<8x2x8xf32>
    %60 = vector.extract_strided_slice %56 {offsets = [0, 0, 32], sizes = [8, 2, 8], strides = [1, 1, 1]} : vector<8x2x96xf32> to vector<8x2x8xf32>
    %61 = vector.extract_strided_slice %56 {offsets = [0, 0, 64], sizes = [8, 2, 8], strides = [1, 1, 1]} : vector<8x2x96xf32> to vector<8x2x8xf32>
    "tpu.trace_start"() <{level = 10 : i32, message = "tbe,tce->tbc"}> : () -> ()
    %cst_28 = arith.constant dense<0.000000e+00> : vector<8x2x2xf32>
    %62 = tpu.matmul %59, %60, %cst_28 {dimension_numbers = #tpu.dot_dimension_numbers<[2], [2], [1], [1], [0, 0, 0, 1, 1, 1], [0], [0]>} : vector<8x2x8xf32>, vector<8x2x8xf32>, vector<8x2x2xf32> -> vector<8x2x2xf32>
    "tpu.trace_stop"() : () -> ()
    %cst_29 = arith.constant dense<0xFF800000> : vector<8x2xf32>
    %63 = vector.multi_reduction <maximumf>, %62, %cst_29 [2] : vector<8x2x2xf32> to vector<8x2xf32>
    %64 = vector.shape_cast %63 : vector<8x2xf32> to vector<8x2x1xf32>
    %65 = vector.broadcast %64 : vector<8x2x1xf32> to vector<8x2x2xf32>
    %66 = arith.subf %62, %65 : vector<8x2x2xf32>
    %67 = math.exp %66 : vector<8x2x2xf32>
    %cst_30 = arith.constant dense<0.000000e+00> : vector<8x2xf32>
    %68 = vector.multi_reduction <add>, %67, %cst_30 [2] : vector<8x2x2xf32> to vector<8x2xf32>
    %69 = vector.shape_cast %68 : vector<8x2xf32> to vector<8x2x1xf32>
    %70 = tpu.reciprocal %69 {approx = true} : vector<8x2x1xf32> -> vector<8x2x1xf32>
    %71 = vector.broadcast %70 : vector<8x2x1xf32> to vector<8x2x2xf32>
    %72 = arith.mulf %67, %71 : vector<8x2x2xf32>
    "tpu.trace_start"() <{level = 10 : i32, message = "tbc,tce->tbe"}> : () -> ()
    %cst_31 = arith.constant dense<0.000000e+00> : vector<8x2x8xf32>
    %73 = tpu.matmul %72, %61, %cst_31 {dimension_numbers = #tpu.dot_dimension_numbers<[2], [1], [1], [2], [0, 0, 0, 1, 1, 2], [0], [0]>} : vector<8x2x2xf32>, vector<8x2x8xf32>, vector<8x2x8xf32> -> vector<8x2x8xf32>
    "tpu.trace_stop"() : () -> ()
    %74 = vector.extract_strided_slice %56 {offsets = [0, 0, 8], sizes = [8, 2, 8], strides = [1, 1, 1]} : vector<8x2x96xf32> to vector<8x2x8xf32>
    %cst_32 = arith.constant 0.353553385 : f32
    %75 = vector.broadcast %cst_32 : f32 to vector<8x2x8xf32>
    %76 = arith.mulf %74, %75 : vector<8x2x8xf32>
    %77 = vector.extract_strided_slice %56 {offsets = [0, 0, 40], sizes = [8, 2, 8], strides = [1, 1, 1]} : vector<8x2x96xf32> to vector<8x2x8xf32>
    %78 = vector.extract_strided_slice %56 {offsets = [0, 0, 72], sizes = [8, 2, 8], strides = [1, 1, 1]} : vector<8x2x96xf32> to vector<8x2x8xf32>
    "tpu.trace_start"() <{level = 10 : i32, message = "tbe,tce->tbc"}> : () -> ()
    %cst_33 = arith.constant dense<0.000000e+00> : vector<8x2x2xf32>
    %79 = tpu.matmul %76, %77, %cst_33 {dimension_numbers = #tpu.dot_dimension_numbers<[2], [2], [1], [1], [0, 0, 0, 1, 1, 1], [0], [0]>} : vector<8x2x8xf32>, vector<8x2x8xf32>, vector<8x2x2xf32> -> vector<8x2x2xf32>
    "tpu.trace_stop"() : () -> ()
    %cst_34 = arith.constant dense<0xFF800000> : vector<8x2xf32>
    %80 = vector.multi_reduction <maximumf>, %79, %cst_34 [2] : vector<8x2x2xf32> to vector<8x2xf32>
    %81 = vector.shape_cast %80 : vector<8x2xf32> to vector<8x2x1xf32>
    %82 = vector.broadcast %81 : vector<8x2x1xf32> to vector<8x2x2xf32>
    %83 = arith.subf %79, %82 : vector<8x2x2xf32>
    %84 = math.exp %83 : vector<8x2x2xf32>
    %cst_35 = arith.constant dense<0.000000e+00> : vector<8x2xf32>
    %85 = vector.multi_reduction <add>, %84, %cst_35 [2] : vector<8x2x2xf32> to vector<8x2xf32>
    %86 = vector.shape_cast %85 : vector<8x2xf32> to vector<8x2x1xf32>
    %87 = tpu.reciprocal %86 {approx = true} : vector<8x2x1xf32> -> vector<8x2x1xf32>
    %88 = vector.broadcast %87 : vector<8x2x1xf32> to vector<8x2x2xf32>
    %89 = arith.mulf %84, %88 : vector<8x2x2xf32>
    "tpu.trace_start"() <{level = 10 : i32, message = "tbc,tce->tbe"}> : () -> ()
    %cst_36 = arith.constant dense<0.000000e+00> : vector<8x2x8xf32>
    %90 = tpu.matmul %89, %78, %cst_36 {dimension_numbers = #tpu.dot_dimension_numbers<[2], [1], [1], [2], [0, 0, 0, 1, 1, 2], [0], [0]>} : vector<8x2x2xf32>, vector<8x2x8xf32>, vector<8x2x8xf32> -> vector<8x2x8xf32>
    "tpu.trace_stop"() : () -> ()
    %91 = vector.extract_strided_slice %56 {offsets = [0, 0, 16], sizes = [8, 2, 8], strides = [1, 1, 1]} : vector<8x2x96xf32> to vector<8x2x8xf32>
    %cst_37 = arith.constant 0.353553385 : f32
    %92 = vector.broadcast %cst_37 : f32 to vector<8x2x8xf32>
    %93 = arith.mulf %91, %92 : vector<8x2x8xf32>
    %94 = vector.extract_strided_slice %56 {offsets = [0, 0, 48], sizes = [8, 2, 8], strides = [1, 1, 1]} : vector<8x2x96xf32> to vector<8x2x8xf32>
    %95 = vector.extract_strided_slice %56 {offsets = [0, 0, 80], sizes = [8, 2, 8], strides = [1, 1, 1]} : vector<8x2x96xf32> to vector<8x2x8xf32>
    "tpu.trace_start"() <{level = 10 : i32, message = "tbe,tce->tbc"}> : () -> ()
    %cst_38 = arith.constant dense<0.000000e+00> : vector<8x2x2xf32>
    %96 = tpu.matmul %93, %94, %cst_38 {dimension_numbers = #tpu.dot_dimension_numbers<[2], [2], [1], [1], [0, 0, 0, 1, 1, 1], [0], [0]>} : vector<8x2x8xf32>, vector<8x2x8xf32>, vector<8x2x2xf32> -> vector<8x2x2xf32>
    "tpu.trace_stop"() : () -> ()
    %cst_39 = arith.constant dense<0xFF800000> : vector<8x2xf32>
    %97 = vector.multi_reduction <maximumf>, %96, %cst_39 [2] : vector<8x2x2xf32> to vector<8x2xf32>
    %98 = vector.shape_cast %97 : vector<8x2xf32> to vector<8x2x1xf32>
    %99 = vector.broadcast %98 : vector<8x2x1xf32> to vector<8x2x2xf32>
    %100 = arith.subf %96, %99 : vector<8x2x2xf32>
    %101 = math.exp %100 : vector<8x2x2xf32>
    %cst_40 = arith.constant dense<0.000000e+00> : vector<8x2xf32>
    %102 = vector.multi_reduction <add>, %101, %cst_40 [2] : vector<8x2x2xf32> to vector<8x2xf32>
    %103 = vector.shape_cast %102 : vector<8x2xf32> to vector<8x2x1xf32>
    %104 = tpu.reciprocal %103 {approx = true} : vector<8x2x1xf32> -> vector<8x2x1xf32>
    %105 = vector.broadcast %104 : vector<8x2x1xf32> to vector<8x2x2xf32>
    %106 = arith.mulf %101, %105 : vector<8x2x2xf32>
    "tpu.trace_start"() <{level = 10 : i32, message = "tbc,tce->tbe"}> : () -> ()
    %cst_41 = arith.constant dense<0.000000e+00> : vector<8x2x8xf32>
    %107 = tpu.matmul %106, %95, %cst_41 {dimension_numbers = #tpu.dot_dimension_numbers<[2], [1], [1], [2], [0, 0, 0, 1, 1, 2], [0], [0]>} : vector<8x2x2xf32>, vector<8x2x8xf32>, vector<8x2x8xf32> -> vector<8x2x8xf32>
    "tpu.trace_stop"() : () -> ()
    %108 = vector.extract_strided_slice %56 {offsets = [0, 0, 24], sizes = [8, 2, 8], strides = [1, 1, 1]} : vector<8x2x96xf32> to vector<8x2x8xf32>
    %cst_42 = arith.constant 0.353553385 : f32
    %109 = vector.broadcast %cst_42 : f32 to vector<8x2x8xf32>
    %110 = arith.mulf %108, %109 : vector<8x2x8xf32>
    %111 = vector.extract_strided_slice %56 {offsets = [0, 0, 56], sizes = [8, 2, 8], strides = [1, 1, 1]} : vector<8x2x96xf32> to vector<8x2x8xf32>
    %112 = vector.extract_strided_slice %56 {offsets = [0, 0, 88], sizes = [8, 2, 8], strides = [1, 1, 1]} : vector<8x2x96xf32> to vector<8x2x8xf32>
    "tpu.trace_start"() <{level = 10 : i32, message = "tbe,tce->tbc"}> : () -> ()
    %cst_43 = arith.constant dense<0.000000e+00> : vector<8x2x2xf32>
    %113 = tpu.matmul %110, %111, %cst_43 {dimension_numbers = #tpu.dot_dimension_numbers<[2], [2], [1], [1], [0, 0, 0, 1, 1, 1], [0], [0]>} : vector<8x2x8xf32>, vector<8x2x8xf32>, vector<8x2x2xf32> -> vector<8x2x2xf32>
    "tpu.trace_stop"() : () -> ()
    %cst_44 = arith.constant dense<0xFF800000> : vector<8x2xf32>
    %114 = vector.multi_reduction <maximumf>, %113, %cst_44 [2] : vector<8x2x2xf32> to vector<8x2xf32>
    %115 = vector.shape_cast %114 : vector<8x2xf32> to vector<8x2x1xf32>
    %116 = vector.broadcast %115 : vector<8x2x1xf32> to vector<8x2x2xf32>
    %117 = arith.subf %113, %116 : vector<8x2x2xf32>
    %118 = math.exp %117 : vector<8x2x2xf32>
    %cst_45 = arith.constant dense<0.000000e+00> : vector<8x2xf32>
    %119 = vector.multi_reduction <add>, %118, %cst_45 [2] : vector<8x2x2xf32> to vector<8x2xf32>
    %120 = vector.shape_cast %119 : vector<8x2xf32> to vector<8x2x1xf32>
    %121 = tpu.reciprocal %120 {approx = true} : vector<8x2x1xf32> -> vector<8x2x1xf32>
    %122 = vector.broadcast %121 : vector<8x2x1xf32> to vector<8x2x2xf32>
    %123 = arith.mulf %118, %122 : vector<8x2x2xf32>
    "tpu.trace_start"() <{level = 10 : i32, message = "tbc,tce->tbe"}> : () -> ()
    %cst_46 = arith.constant dense<0.000000e+00> : vector<8x2x8xf32>
    %124 = tpu.matmul %123, %112, %cst_46 {dimension_numbers = #tpu.dot_dimension_numbers<[2], [1], [1], [2], [0, 0, 0, 1, 1, 2], [0], [0]>} : vector<8x2x2xf32>, vector<8x2x8xf32>, vector<8x2x8xf32> -> vector<8x2x8xf32>
    "tpu.trace_stop"() : () -> ()
    %125 = tpu.concatenate %73, %90, %107, %124 in 2 : vector<8x2x8xf32>, vector<8x2x8xf32>, vector<8x2x8xf32>, vector<8x2x8xf32> -> vector<8x2x32xf32>
    %126 = vector.shape_cast %125 : vector<8x2x32xf32> to vector<16x32xf32>
    %c0_47 = arith.constant 0 : index
    %c0_48 = arith.constant 0 : index
    %127 = vector.load %arg11[%c0_47, %c0_48] : memref<32x32xf32, #tpu.memory_space<vmem>>, vector<32x32xf32>
    %cst_49 = arith.constant dense<0.000000e+00> : vector<16x32xf32>
    %128 = tpu.matmul %126, %127, %cst_49 {dimension_numbers = #tpu.dot_dimension_numbers<[1], [1], [0], [0], [0, 0, 1, 0], [], []>} : vector<16x32xf32>, vector<32x32xf32>, vector<16x32xf32> -> vector<16x32xf32>
    %c0_50 = arith.constant 0 : index
    %c0_51 = arith.constant 0 : index
    %129 = vector.load %arg12[%c0_50, %c0_51] : memref<1x32xf32, #tpu.memory_space<vmem>>, vector<1x32xf32>
    %130 = vector.broadcast %129 : vector<1x32xf32> to vector<16x32xf32>
    %131 = arith.addf %128, %130 : vector<16x32xf32>
    %132 = arith.mulf %131, %20 : vector<16x32xf32>
    %133 = arith.addf %132, %24 : vector<16x32xf32>
    %cst_52 = arith.constant dense<0.000000e+00> : vector<16xf32>
    %134 = vector.multi_reduction <add>, %133, %cst_52 [1] : vector<16x32xf32> to vector<16xf32>
    %135 = vector.shape_cast %134 : vector<16xf32> to vector<16x1xf32>
    %cst_53 = arith.constant 3.200000e+01 : f32
    %136 = vector.broadcast %cst_53 : f32 to vector<16x1xf32>
    %137 = arith.divf %135, %136 : vector<16x1xf32>
    %138 = vector.broadcast %137 : vector<16x1xf32> to vector<16x32xf32>
    %139 = arith.subf %133, %138 : vector<16x32xf32>
    %140 = arith.mulf %139, %139 : vector<16x32xf32>
    %cst_54 = arith.constant dense<0.000000e+00> : vector<16xf32>
    %141 = vector.multi_reduction <add>, %140, %cst_54 [1] : vector<16x32xf32> to vector<16xf32>
    %142 = vector.shape_cast %141 : vector<16xf32> to vector<16x1xf32>
    %cst_55 = arith.constant 3.200000e+01 : f32
    %143 = vector.broadcast %cst_55 : f32 to vector<16x1xf32>
    %144 = arith.divf %142, %143 : vector<16x1xf32>
    %145 = vector.broadcast %137 : vector<16x1xf32> to vector<16x32xf32>
    %146 = arith.subf %133, %145 : vector<16x32xf32>
    %cst_56 = arith.constant 9.99999974E-6 : f32
    %147 = vector.broadcast %cst_56 : f32 to vector<16x1xf32>
    %148 = arith.addf %144, %147 : vector<16x1xf32>
    %149 = math.rsqrt %148 : vector<16x1xf32>
    %150 = vector.broadcast %149 : vector<16x1xf32> to vector<16x32xf32>
    %151 = arith.mulf %146, %150 : vector<16x32xf32>
    %c0_57 = arith.constant 0 : index
    %c0_58 = arith.constant 0 : index
    %152 = vector.load %arg7[%c0_57, %c0_58] : memref<1x32xf32, #tpu.memory_space<vmem>>, vector<1x32xf32>
    %153 = vector.broadcast %152 : vector<1x32xf32> to vector<16x32xf32>
    %154 = arith.mulf %151, %153 : vector<16x32xf32>
    %c0_59 = arith.constant 0 : index
    %c0_60 = arith.constant 0 : index
    %155 = vector.load %arg8[%c0_59, %c0_60] : memref<1x32xf32, #tpu.memory_space<vmem>>, vector<1x32xf32>
    %156 = vector.broadcast %155 : vector<1x32xf32> to vector<16x32xf32>
    %157 = arith.addf %154, %156 : vector<16x32xf32>
    %158 = arith.mulf %157, %21 : vector<16x32xf32>
    %159 = arith.addf %158, %22 : vector<16x32xf32>
    %c0_61 = arith.constant 0 : index
    %c0_62 = arith.constant 0 : index
    %160 = vector.load %arg13[%c0_61, %c0_62] : memref<64x32xf32, #tpu.memory_space<vmem>>, vector<64x32xf32>
    %cst_63 = arith.constant dense<0.000000e+00> : vector<16x64xf32>
    %161 = tpu.matmul %159, %160, %cst_63 {dimension_numbers = #tpu.dot_dimension_numbers<[1], [1], [0], [0], [0, 0, 1, 0], [], []>} : vector<16x32xf32>, vector<64x32xf32>, vector<16x64xf32> -> vector<16x64xf32>
    %c0_64 = arith.constant 0 : index
    %c0_65 = arith.constant 0 : index
    %162 = vector.load %arg14[%c0_64, %c0_65] : memref<1x64xf32, #tpu.memory_space<vmem>>, vector<1x64xf32>
    %163 = vector.broadcast %162 : vector<1x64xf32> to vector<16x64xf32>
    %164 = arith.addf %161, %163 : vector<16x64xf32>
    %cst_66 = arith.constant 5.000000e-01 : f32
    %165 = vector.broadcast %cst_66 : f32 to vector<16x64xf32>
    %166 = arith.mulf %165, %164 : vector<16x64xf32>
    %cst_67 = arith.constant 4.471500e-02 : f32
    %167 = vector.broadcast %cst_67 : f32 to vector<16x64xf32>
    %168 = arith.mulf %167, %164 : vector<16x64xf32>
    %169 = arith.mulf %168, %164 : vector<16x64xf32>
    %170 = arith.mulf %169, %164 : vector<16x64xf32>
    %171 = arith.addf %164, %170 : vector<16x64xf32>
    %cst_68 = arith.constant 0.797884583 : f32
    %172 = vector.broadcast %cst_68 : f32 to vector<16x64xf32>
    %173 = arith.mulf %172, %171 : vector<16x64xf32>
    %174 = math.tanh %173 : vector<16x64xf32>
    %cst_69 = arith.constant 1.000000e+00 : f32
    %175 = vector.broadcast %cst_69 : f32 to vector<16x64xf32>
    %176 = arith.addf %175, %174 : vector<16x64xf32>
    %177 = arith.mulf %166, %176 : vector<16x64xf32>
    %c0_70 = arith.constant 0 : index
    %c0_71 = arith.constant 0 : index
    %178 = vector.load %arg15[%c0_70, %c0_71] : memref<32x64xf32, #tpu.memory_space<vmem>>, vector<32x64xf32>
    %cst_72 = arith.constant dense<0.000000e+00> : vector<16x32xf32>
    %179 = tpu.matmul %177, %178, %cst_72 {dimension_numbers = #tpu.dot_dimension_numbers<[1], [1], [0], [0], [0, 0, 1, 0], [], []>} : vector<16x64xf32>, vector<32x64xf32>, vector<16x32xf32> -> vector<16x32xf32>
    %c0_73 = arith.constant 0 : index
    %c0_74 = arith.constant 0 : index
    %180 = vector.load %arg16[%c0_73, %c0_74] : memref<1x32xf32, #tpu.memory_space<vmem>>, vector<1x32xf32>
    %181 = vector.broadcast %180 : vector<1x32xf32> to vector<16x32xf32>
    %182 = arith.addf %179, %181 : vector<16x32xf32>
    %183 = arith.mulf %182, %23 : vector<16x32xf32>
    %184 = arith.addf %133, %183 : vector<16x32xf32>
    %c0_75 = arith.constant 0 : index
    %c0_76 = arith.constant 0 : index
    %185 = vector.load %arg17[%c0_75, %c0_76] : memref<16x32xf32, #tpu.memory_space<vmem>>, vector<16x32xf32>
    tpu.vector_store %arg17[%c0_75, %c0_76], %184 {strides = array<i32>} : memref<16x32xf32, #tpu.memory_space<vmem>>, vector<16x32xf32>,
    return
  }
}

</mosaic_0001>

<bundles_post_ra>
// kernel: tpu_custom_call.1
= control target key start
LH: loop header
LB: loop body
LE: loop exit
PB: predicated region body
PF: predicated region fallthrough
CT: control target
= control target key end

     0   :  { %s9082_s0 = inlined_call_operand.vmem [shape: f32[3,2,32], index: 0, kind: input, shape index: {}]   ;;  %s9083_s1 = inlined_call_operand.vmem [shape: f32[2,32], index: 1, kind: input, shape index: {}]   ;;  %s9084_s2 = inlined_call_operand.vmem [shape: f32[16,32], index: 2, kind: input, shape index: {}]   ;;  %s9085_s3 = inlined_call_operand.vmem [shape: f32[192,32], index: 3, kind: input, shape index: {}]   ;;  %s9086_s4 = inlined_call_operand.vmem [shape: f32[1,192], index: 4, kind: input, shape index: {}]   ;;  %s9087_s5 = inlined_call_operand.vmem [shape: f32[1,32], index: 5, kind: input, shape index: {}]   ;;  %s9088_s6 = inlined_call_operand.vmem [shape: f32[1,32], index: 6, kind: input, shape index: {}]   ;;  %s9089_s7 = inlined_call_operand.vmem [shape: f32[1,32], index: 7, kind: input, shape index: {}]   ;;  %s9090_s8 = inlined_call_operand.vmem [shape: f32[1,32], index: 8, kind: input, shape index: {}]   ;;  %s9091_s9 = inlined_call_operand.vmem [shape: f32[96,32], index: 9, kind: input, shape index: {}]   ;;  %s9092_s10 = inlined_call_operand.vmem [shape: f32[1,96], index: 10, kind: input, shape index: {}]   ;;  %s9093_s11 = inlined_call_operand.vmem [shape: f32[32,32], index: 11, kind: input, shape index: {}]   ;;  %s9094_s12 = inlined_call_operand.vmem [shape: f32[1,32], index: 12, kind: input, shape index: {}]   ;;  %s9095_s13 = inlined_call_operand.vmem [shape: f32[64,32], index: 13, kind: input, shape index: {}]   ;;  %s9096_s14 = inlined_call_operand.vmem [shape: f32[1,64], index: 14, kind: input, shape index: {}]   ;;  %s9097_s15 = inlined_call_operand.vmem [shape: f32[32,64], index: 15, kind: input, shape index: {}]   ;;  %s9098_s16 = inlined_call_operand.vmem [shape: f32[1,32], index: 16, kind: input, shape index: {}]   ;;  %s9099_s17 = inlined_call_operand.hbm [shape: f32[16,32], index: 17, kind: output, shape index: {}]  }
   0x1   :  { %9106 = sst [smem:[#allocation9_spill]] %s9082_s0 }
   0x2   :  { %9107 = sst [smem:[#allocation10_spill]] %s9083_s1 }
   0x3   :  { %vm113_vm0 = vcmask 261120   ;;  %v7725_v0 = vld [vmem:[%s9084_s2] sm:$0xff]  ;;  %v78_v2 = vld [vmem:[%s9085_s3 + $0x8] sm:$0xff]  ;;  %v7611_v3 = vmov 0.0|0.0   ;;  %v9101_v8 = vmov 0.0   ;;  %v79_v10 = vld [vmem:[%s9085_s3 + $0x10] sm:$0xff] }
   0x4   :  { %v77_v1 = vld [vmem:[%s9085_s3] sm:$0xff]  ;;  %7288 = vmatprep.subr.bf16.mxu0 %v7611_v3  ;;  %v285_v4 = vsel %vm113_vm0, %v7725_v0, 0.0  ;;  %vm7738_vm1 = vmpackc.low %vm113_vm0, %vm113_vm0  ;;  %v7745_v7 = vld [vmem:[%s9084_s2 + $0x8] sm:$0xff]  ;;  %253 = vmatprep.mubr.f32.mxu0 %v9101_v8 }
   0x5   :  { %v7289_v6 = vpack.c.bf16 %v78_v2, %v77_v1  ;;  %286 = vadd.xlane.f32.xlu0 %v285_v4  ;;  %v288_v9 = vsel %vm113_vm0, %v7745_v7, 0.0  ;;  %v80_v11 = vld [vmem:[%s9085_s3 + $0x18] sm:$0xff] }
   0x6   :  { %v7293_v12 = vpack.c.bf16 %v80_v11, %v79_v10 }
   0x7   :  { %7291 = vmatpush1.bf16.xpose.msk.msra.mxu0 %vm7738_vm1, %v7289_v6 }
   0x8   :  { %7292 = vmatprep.subr.bf16.mxu0 %v7611_v3 }
   0x9   :  { %289 = vadd.xlane.f32.xlu0 %v288_v9 }
   0xf   :  { %7295 = vmatpush1.bf16.xpose.msk.msra.mxu0 %vm7738_vm1, %v7293_v12 }
  0x10   :  { %22 = vsyncpa [#allocation3], 0  ;;  %7296 = vmatprep.subr.bf16.mxu0 %v7611_v3  ;;  %v81_v13 = vld [vmem:[%s9085_s3 + $0x20] sm:$0xff]  ;;  %v82_v14 = vld [vmem:[%s9085_s3 + $0x28] sm:$0xff]  ;;  %s9110_s24 = sld [smem:[#allocation9_spill]]  ;;  %vm60_vm2 = vcmask 254976   ;;  %v103_v9 = vlaneseq }
  0x11   :  { %v7297_v15 = vpack.c.bf16 %v82_v14, %v81_v13  ;;  %v83_v16 = vld [vmem:[%s9085_s3 + $0x30] sm:$0xff]  ;;  %v84_v17 = vld [vmem:[%s9085_s3 + $0x38] sm:$0xff]  ;;  %v85_v19 = vld [vmem:[%s9085_s3 + $0x40] sm:$0xff]  ;;  %vm274_vm3 = vcmask 1041408   ;;  %vm277_vm4 = vcmask 1043456   ;;  %vm280_vm5 = vcmask 1045504  }
  0x12   :  { %v7301_v18 = vpack.c.bf16 %v84_v17, %v83_v16  ;;  %v86_v20 = vld [vmem:[%s9085_s3 + $0x48] sm:$0xff]  ;;  %v87_v22 = vld [vmem:[%s9085_s3 + $0x50] sm:$0xff]  ;;  %v88_v23 = vld [vmem:[%s9085_s3 + $0x58] sm:$0xff]  ;;  %vm7615_vm6 = vmmov 0   ;;  %s7617_s22 = smov 88   ;;  %s7618_s23 = smov 120  }
  0x13   :  { %v7305_v21 = vpack.c.bf16 %v86_v20, %v85_v19  ;;  %v7309_v26 = vpack.c.bf16 %v88_v23, %v87_v22  ;;  %v89_v30 = vld [vmem:[%s9085_s3 + $0x60] sm:$0xff]  ;;  %v90_v31 = vld [vmem:[%s9085_s3 + $0x68] sm:$0xff]  ;;  %v91_v36 = vld [vmem:[%s9085_s3 + $0x70] sm:$0xff]  ;;  %vm535_vm7 = vcmask 64512   ;;  %vm1199_vm8 = vcmask 9216   ;;  %s7620_s25 = smov 80  }
  0x14   :  { %v7313_v34 = vpack.c.bf16 %v90_v31, %v89_v30  ;;  %v92_v37 = vld [vmem:[%s9085_s3 + $0x78] sm:$0xff]  ;;  %v93_v42 = vld [vmem:[%s9085_s3 + $0x80] sm:$0xff]  ;;  %v94_v43 = vld [vmem:[%s9085_s3 + $0x88] sm:$0xff]  ;;  %vm1290_vm9 = vcmask 15360   ;;  %s7622_s26 = smov 48   ;;  %s7623_s27 = smov 72  }
  0x15   :  { %v7317_v40 = vpack.c.bf16 %v92_v37, %v91_v36  ;;  %v7321_v45 = vpack.c.bf16 %v94_v43, %v93_v42  ;;  %v95_v46 = vld [vmem:[%s9085_s3 + $0x90] sm:$0xff]  ;;  %v96_v47 = vld [vmem:[%s9085_s3 + $0x98] sm:$0xff]  ;;  %v97_v50 = vld [vmem:[%s9085_s3 + $0xa0] sm:$0xff]  ;;  %s7624_s28 = smov 104   ;;  %s7625_s29 = smov 40   ;;  %vm6049_vm10 = vcmask 130048  }
  0x16   :  { %v57_v24 = vld [vmem:[%s9110_s24] sm:$0x3]  ;;  %v58_v25 = vld [vmem:[%s9110_s24 + $0x2] sm:$0x3]  ;;  %v59_v29 = vld [vmem:[%s9110_s24 + $0x4] sm:$0x3]  ;;  %v7325_v48 = vpack.c.bf16 %v96_v47, %v95_v46 }
  0x17   :  { %7299 = vmatpush1.bf16.xpose.msk.msra.mxu0 %vm7738_vm1, %v7297_v15  ;;  %v61_v27 = vsel %vm60_vm2, %v57_v24, 0.0  ;;  %v62_v28 = vsel %vm60_vm2, %v58_v25, 0.0  ;;  %v64_v33 = vsel %vm60_vm2, %v59_v29, 0.0  ;;  %s9111_s24 = sld [smem:[#allocation10_spill]]  ;;  %v98_v51 = vld [vmem:[%s9085_s3 + $0xa8] sm:$0xff]  ;;  %v99_v54 = vld [vmem:[%s9085_s3 + $0xb0] sm:$0xff] }
  0x18   :  { %7300 = vmatprep.subr.bf16.mxu0 %v7611_v3  ;;  %v63_v32 = vadd.f32 %v62_v28, %v61_v27  ;;  %v7329_v53 = vpack.c.bf16 %v98_v51, %v97_v50  ;;  %v100_v55 = vld [vmem:[%s9085_s3 + $0xb8] sm:$0xff]  ;;  %v101_v10 = vld [vmem:[%s9086_s4] sm:$0x3]  ;;  %v339_v13 = vld [vmem:[%s9091_s9 + $0x8] sm:$0xff]  ;;  %s7621_s3 = smov 112   ;;  %s7626_s0 = smov 8  }
  0x19   :  { %v7333_v56 = vpack.c.bf16 %v100_v55, %v99_v54  ;;  %v338_v12 = vld [vmem:[%s9091_s9] sm:$0xff]  ;;  %v340_v14 = vld [vmem:[%s9091_s9 + $0x10] sm:$0xff]  ;;  %v341_v16 = vld [vmem:[%s9091_s9 + $0x18] sm:$0xff]  ;;  %s7627_s30 = smov 16   ;;  %s7628_s20 = smov 24   ;;  %vm6058_vm11 = vcmask 195584  }
  0x1a   :  { %v65_v35 = vadd.f32 %v64_v33, %v63_v32  ;;  %v7336_v15 = vpack.c.bf16 %v339_v13, %v338_v12  ;;  %v7342_v17 = vpack.c.bf16 %v341_v16, %v340_v14  ;;  %v343_v19 = vld [vmem:[%s9091_s9 + $0x28] sm:$0xff]  ;;  %v345_v22 = vld [vmem:[%s9091_s9 + $0x38] sm:$0xff]  ;;  %v346_v24 = vld [vmem:[%s9091_s9 + $0x40] sm:$0xff]  ;;  %vm6418_vm12 = vcmask 523264  }
  0x1b   :  { %v347_v25 = vld [vmem:[%s9091_s9 + $0x48] sm:$0xff]  ;;  %v348_v27 = vld [vmem:[%s9091_s9 + $0x50] sm:$0xff]  ;;  %v349_v28 = vld [vmem:[%s9091_s9 + $0x58] sm:$0xff] }
  0x1c   :  { %v67_v38 = vmul.f32 0.33333334, %v65_v35  ;;  %7338 = vmatprep.subr.msk.bf16.mxu1 %vm7738_vm1, %v7336_v15  ;;  %v7366_v29 = vpack.c.bf16 %v349_v28, %v348_v27  ;;  %vm7409_vm13 = vmpackc.low %vm6418_vm12, %vm6418_vm12 }
  0x1d   :  { %v68_v39 = vld [vmem:[%s9111_s24] sm:$0x3]  ;;  %7341 = vmatpush3.bf16.xpose.msk.msra.mxu1 %vm7738_vm1, %v7336_v15  ;;  %s7619_s24 = smov 56  }
  0x1e   :  { %v69_v41 = vadd.f32 %v68_v39, %v67_v38  ;;  %7344 = vmatprep.subr.msk.bf16.mxu1 %vm7738_vm1, %v7342_v17 }
  0x1f   :  { %7303 = vmatpush1.bf16.xpose.msk.msra.mxu0 %vm7738_vm1, %v7301_v18  ;;  %v342_v18 = vld [vmem:[%s9091_s9 + $0x20] sm:$0xff] }
  0x20   :  { %7304 = vmatprep.subr.bf16.mxu0 %v7611_v3  ;;  %v6538_v44 = vmul.f32 -1.442695, %v69_v41  ;;  %v7348_v20 = vpack.c.bf16 %v343_v19, %v342_v18 }
  0x22   :  { %7441 = vpow2.f32 %v6538_v44 }
  0x25   :  { %7347 = vmatpush3.bf16.xpose.msk.msra.mxu1 %vm7738_vm1, %v7342_v17 }
  0x26   :  { %7350 = vmatprep.subr.msk.bf16.mxu1 %vm7738_vm1, %v7348_v20 }
  0x27   :  { %7307 = vmatpush1.bf16.xpose.msk.msra.mxu0 %vm7738_vm1, %v7305_v21  ;;  %v344_v21 = vld [vmem:[%s9091_s9 + $0x30] sm:$0xff]  ;;  %s7613_s9 = smov 96  }
  0x28   :  { %7308 = vmatprep.subr.bf16.mxu0 %v7611_v3  ;;  %v7354_v23 = vpack.c.bf16 %v345_v22, %v344_v21 }
  0x2c   :  { %v7442_v49 = vpop.eup %7441 }
  0x2d   :  { %v73_v52 = vadd.f32 1.0, %v7442_v49  ;;  %7353 = vmatpush3.bf16.xpose.msk.msra.mxu1 %vm7738_vm1, %v7348_v20 }
  0x2e   :  { %7356 = vmatprep.subr.msk.bf16.mxu1 %vm7738_vm1, %v7354_v23 }
  0x2f   :  { %7311 = vmatpush1.bf16.xpose.msk.msra.mxu0 %vm7738_vm1, %v7309_v26  ;;  %7443 = vrcp.f32 %v73_v52  ;;  %v7360_v26 = vpack.c.bf16 %v347_v25, %v346_v24 }
  0x30   :  { %7312 = vmatprep.subr.bf16.mxu0 %v7611_v3 }
  0x35   :  { %7359 = vmatpush3.bf16.xpose.msk.msra.mxu1 %vm7738_vm1, %v7354_v23 }
  0x36   :  { %7362 = vmatprep.subr.msk.bf16.mxu1 %vm7738_vm1, %v7360_v26 }
  0x37   :  { %7315 = vmatpush1.bf16.xpose.msk.msra.mxu0 %vm7738_vm1, %v7313_v34 }
  0x38   :  { %7316 = vmatprep.subr.bf16.mxu0 %v7611_v3 }
  0x39   :  { %v7444_v57 = vpop.eup %7443 }
  0x3a   :  { %v76_v58 = vmul.f32 %v7444_v57, %v69_v41 }
  0x3d   :  { %7365 = vmatpush3.bf16.xpose.msk.msra.mxu1 %vm7738_vm1, %v7360_v26 }
  0x3e   :  { %7368 = vmatprep.subr.msk.bf16.mxu1 %vm7738_vm1, %v7366_v29 }
  0x3f   :  { %7319 = vmatpush1.bf16.xpose.msk.msra.mxu0 %vm7738_vm1, %v7317_v40 }
  0x40   :  { %7320 = vmatprep.subr.bf16.mxu0 %v7611_v3 }
  0x45   :  { %7371 = vmatpush3.bf16.xpose.msk.msra.mxu1 %vm7738_vm1, %v7366_v29 }
  0x46   :  { %6927 = vmatprep.subr.mxu1 %v9101_v8 }
  0x47   :  { %7323 = vmatpush1.bf16.xpose.msk.msra.mxu0 %vm7738_vm1, %v7321_v45 }
  0x48   :  { %7324 = vmatprep.subr.bf16.mxu0 %v7611_v3 }
  0x4f   :  { %7327 = vmatpush1.bf16.xpose.msk.msra.mxu0 %vm7738_vm1, %v7325_v48 }
  0x50   :  { %7328 = vmatprep.subr.bf16.mxu0 %v7611_v3 }
  0x57   :  { %7331 = vmatpush1.bf16.xpose.msk.msra.mxu0 %vm7738_vm1, %v7329_v53 }
  0x58   :  { %7332 = vmatprep.subr.bf16.mxu0 %v7611_v3 }
  0x5f   :  { %7335 = vmatpush1.bf16.xpose.msk.msra.mxu0 %vm7738_vm1, %v7333_v56 }
  0x60   :  { %6987 = vmatprep.subr.mxu0 %v9101_v8 }
  0x66   :  { %6563 = vmatmul.mubr.msk.f32.vlgmr.msra.gmra.mrb[0].mxu0 %vm113_vm0, %v76_v58  ;;  %v6564_v58 = vld [vmem:[%s9087_s5] ss:$0 sm:$0xff] }
  0x67   :  { %6989 = vmatprep.mubr.msk.f32.mxu0 %vm7615_vm6, %v9101_v8 }
  0x92   :  { %v287_v59 = vpop.xlane.xlu0 %286 }
  0x93   :  { %v292_v60 = vmul.f32 0.03125, %v287_v59 }
  0x95   :  { %v7866_v61 = vsub.f32 %v7725_v0, %v292_v60  ;;  %v7877_v0 = vshrl.u32 %v103_v9, 7 }
  0x96   :  { %v290_v62 = vpop.xlane.xlu0 %289 }
  0x97   :  { %v293_v63 = vmul.f32 0.03125, %v290_v62  ;;  %v296_v1 = vmul.f32 %v7866_v61, %v7866_v61  ;;  %v109_v11 = vsub.s32 1, %v7877_v0  ;;  %v105_v30 = vsub.s32 0, %v7877_v0  ;;  %v6565_v62 = vld [vmem:[%s9088_s6] ss:$0 sm:$0xff] }
  0x99   :  { %v7871_v2 = vsub.f32 %v7745_v7, %v293_v63  ;;  %v298_v3 = vsel %vm113_vm0, %v296_v1, 0.0  ;;  %v110_v7 = vrot.slane %v101_v10, %v109_v11  ;;  %v106_v31 = vrot.slane %v101_v10, %v105_v30 }
  0x9a   :  { %299 = vadd.xlane.f32.xlu1 %v298_v3 }
  0x9b   :  { %v297_v4 = vmul.f32 %v7871_v2, %v7871_v2 }
  0x9d   :  { %v301_v6 = vsel %vm113_vm0, %v297_v4, 0.0 }
  0x9e   :  { %302 = vadd.xlane.f32.xlu1 %v301_v6 }
 0x127   :  { %v300_v48 = vpop.xlane.xlu1 %299 }
 0x128   :  { %v304_v51 = vmul.f32 0.03125, %v300_v48 }
 0x12a   :  { %v306_v53 = vadd.f32 1e-05, %v304_v51 }
 0x12b   :  { %v303_v49 = vpop.xlane.xlu1 %302 }
 0x12c   :  { %v305_v50 = vmul.f32 0.03125, %v303_v49 }
 0x12e   :  { %v307_v52 = vadd.f32 1e-05, %v305_v50 }
 0x130   :  { %7445 = vrsqrt.f32 %v307_v52 }
 0x131   :  { %7447 = vrsqrt.f32 %v306_v53 }
 0x139   :  { %v255_v32 = vpop.f32.mrb[0].mxu0 }
 0x13a   :  { %v256_v33 = vadd.f32 %v255_v32, %v106_v31  ;;  %v257_v34 = vpop.f32.mrb[1].mxu0  ;;  %v7446_v54 = vpop.eup %7445 }
 0x13b   :  { %v258_v35 = vadd.f32 %v257_v34, %v110_v7  ;;  %v7448_v55 = vpop.eup %7447  ;;  %v311_v56 = vmul.f32 %v7446_v54, %v7871_v2  ;;  %v6566_v7 = vld [vmem:[%s9092_s10] ss:$0 sm:$0xff]  ;;  %s7616_s10 = smov 64  }
 0x13c   :  { %v262_v36 = vrot.slane %v256_v33, 6  ;;  %v266_v37 = vrot.slane %v256_v33, 4  ;;  %v270_v40 = vrot.slane %v256_v33, 2  ;;  %v310_v57 = vmul.f32 %v7448_v55, %v7866_v61 }
 0x13d   :  { %v263_v38 = vrot.slane %v258_v35, 6  ;;  %v267_v39 = vrot.slane %v258_v35, 4  ;;  %v271_v43 = vrot.slane %v258_v35, 2  ;;  %v320_v59 = vmul.f32 %v6564_v58, %v311_v56 }
 0x13e   :  { %v275_v41 = vsel %vm274_vm3, %v256_v33, %v262_v36  ;;  %v319_v60 = vmul.f32 %v6564_v58, %v310_v57  ;;  %v7614_v61 = vmov 1983009808  }
 0x13f   :  { %v278_v42 = vsel %vm277_vm4, %v275_v41, %v266_v37  ;;  %v276_v44 = vsel %vm274_vm3, %v258_v35, %v263_v38  ;;  %v329_v63 = vadd.f32 %v6565_v62, %v320_v59  ;;  %v478_v10 = vunpack.c.l.s4 %v7614_v61 }
 0x140   :  { %v7947_v45 = vsel %vm280_vm5, %v278_v42, %v270_v40  ;;  %v279_v46 = vsel %vm277_vm4, %v276_v44, %v267_v39  ;;  %v328_v1 = vadd.f32 %v6565_v62, %v319_v60 }
 0x141   :  { %333 = vrot.lane.b32.xlu0 %v7947_v45, %s7613_s9  ;;  %v7951_v47 = vsel %vm280_vm5, %v279_v46, %v271_v43  ;;  %v331_v3 = vmul.f32 %v329_v63, %v7947_v45  ;;  %v479_v11 = vunpack.c.0.s8 %v478_v10 }
 0x142   :  { %9112 = vst [vmem:[#allocation5_spill] sm:$0xff] %v7951_v47  ;;  %v330_v4 = vmul.f32 %v328_v1, %v7947_v45 }
 0x143   :  { %v7973_v12 = vsub.s32 %v479_v11, %v7877_v0 }
 0x145   :  { %9113 = vst [vmem:[#allocation6_spill] sm:$0xff] %v7973_v12 }
 0x1b3   :  { %v334_v6 = vpop.permute.xlu0 %333 }
 0x1b4   :  { %v337_v2 = vadd.f32 %v334_v6, %v331_v3  ;;  %v336_v9 = vadd.f32 %v334_v6, %v330_v4 }
 0x1b6   :  { %6924 = vmatprep.mubr.msk.f32.mxu1 %vm113_vm0, %v336_v9 }
 0x1b7   :  { %6925 = vmatmul.mubr.msk.f32.vlgmr.msra.gmra.mrb[0].mxu1 %vm113_vm0, %v337_v2 }
 0x1b8   :  { %6929 = vmatprep.mubr.msk.f32.mxu1 %vm7615_vm6, %v9101_v8 }
 0x28a   :  { %v6926_v13 = vpop.f32.mrb[0].mxu1 }
 0x28b   :  { %v471_v14 = vadd.f32 %v6926_v13, %v6566_v7  ;;  %v465_v15 = vpop.f32.mrb[1].mxu1 }
 0x28c   :  { %v466_v16 = vadd.f32 %v6566_v7, %v465_v15 }
 0x28d   :  { %v493_v19 = vcombine.high %v471_v14, %v471_v14  ;;  %v7977_v20 = vrot.slane %v471_v14, %v7973_v12 }
 0x28e   :  { %v476_v17 = vcombine.high %v466_v16, %v466_v16  ;;  %v483_v18 = vrot.slane %v466_v16, %v7973_v12 }
 0x28f   :  { %v7986_v0 = vrot.slane %v493_v19, %v7973_v12  ;;  %v7990_v25 = vcombine.high %v7977_v20, %v7977_v20  ;;  %v8019_v31 = vrot.slane %v7977_v20, %v7973_v12  ;;  %v8091_v46 = vmul.f32 0.35355338, %v7977_v20 }
 0x290   :  { %v490_v21 = vrot.slane %v476_v17, %v7973_v12  ;;  %v491_v22 = vcombine.high %v483_v18, %v483_v18  ;;  %v7981_v23 = vrot.slane %v483_v18, %v7973_v12  ;;  %v518_v34 = vmul.f32 0.35355338, %v483_v18 }
 0x291   :  { %v8004_v28 = vcombine.high %v7986_v0, %v7986_v0  ;;  %v8008_v29 = vrot.slane %v7990_v25, %v7973_v12  ;;  %v8031_v33 = vrot.slane %v7986_v0, %v7973_v12  ;;  %v8100_v50 = vmul.f32 0.35355338, %v7990_v25 }
 0x292   :  { %v492_v24 = vcombine.high %v490_v21, %v490_v21  ;;  %533 = vrot.lane.b32.xlu1 %v7981_v23, %s7613_s9  ;;  %v7993_v26 = vrot.slane %v491_v22, %v7973_v12  ;;  %v8011_v30 = vrot.slane %v490_v21, %v7973_v12  ;;  %v8054_v35 = vrot.slane %v518_v34, %v7973_v12 }
 0x293   :  { %v8023_v32 = vrot.slane %v8004_v28, %v7973_v12  ;;  %v8066_v38 = vmul.f32 0.35355338, %v491_v22  ;;  %v8074_v40 = vmul.f32 0.35355338, %v490_v21  ;;  %v8111_v52 = vmul.f32 0.35355338, %v7986_v0 }
 0x294   :  { %v7996_v27 = vrot.slane %v492_v24, %v7973_v12  ;;  %v8082_v43 = vmul.f32 0.35355338, %v492_v24  ;;  %v8119_v55 = vmul.f32 0.35355338, %v8004_v28 }
 0x295   :  { %v8143_v20 = vrot.slane %v8066_v38, %v7973_v12 }
 0x296   :  { %618 = vrot.lane.b32.xlu1 %v7993_v26, %s7613_s9  ;;  %786 = vrot.lane.b32.xlu0 %v7996_v27, %s7613_s9 }
 0x29a   :  { %702 = vrot.lane.b32.xlu1 %v8011_v30, %s7613_s9  ;;  %954 = vrot.lane.b32.xlu0 %v8008_v29, %s7613_s9 }
 0x29e   :  { %870 = vrot.lane.b32.xlu1 %v8019_v31, %s7613_s9  ;;  %1122 = vrot.lane.b32.xlu0 %v8023_v32, %s7613_s9 }
 0x2a2   :  { %1038 = vrot.lane.b32.xlu1 %v8031_v33, %s7613_s9  ;;  %1366 = vrot.lane.b32.xlu0 %v7993_v26, %s7616_s10 }
 0x2a6   :  { %1288 = vrot.lane.b32.xlu1 %v7981_v23, %s7616_s10  ;;  %1674 = vrot.lane.b32.xlu0 %v8008_v29, %s7616_s10 }
 0x2aa   :  { %1443 = vrot.lane.b32.xlu1 %v8011_v30, %s7616_s10  ;;  %1828 = vrot.lane.b32.xlu0 %v8023_v32, %s7616_s10 }
 0x2ae   :  { %1597 = vrot.lane.b32.xlu1 %v8019_v31, %s7616_s10  ;;  %1999 = vrot.lane.b32.xlu0 %v7993_v26, %s7617_s22 }
 0x2b2   :  { %1751 = vrot.lane.b32.xlu1 %v8031_v33, %s7616_s10 }
 0x2b6   :  { %1914 = vrot.lane.b32.xlu1 %v7981_v23, %s7617_s22 }
 0x2ba   :  { %1912 = vrot.lane.b32.xlu1 %v8054_v35, %s7618_s23 }
 0x2be   :  { %1520 = vrot.lane.b32.xlu1 %v7996_v27, %s7616_s10 }
 0x304   :  { %v534_v36 = vpop.permute.xlu1 %533 }
 0x305   :  { %6928 = vmatpush3.xpose.msk.msra.mxu1 %vm535_vm7, %v534_v36 }
 0x306   :  { %6932 = vmatprep.subr.mxu1 %v9101_v8 }
 0x308   :  { %6930 = vmatmul.mubr.msk.f32.vlgmr.msra.gmra.mrb[2].mxu1 %vm535_vm7, %v518_v34  ;;  %v619_v37 = vpop.permute.xlu1 %618  ;;  %v787_v41 = vpop.permute.xlu0 %786 }
 0x309   :  { %6933 = vmatpush3.xpose.msk.msra.mxu1 %vm535_vm7, %v619_v37  ;;  %6934 = vmatprep.mubr.msk.f32.mxu1 %vm7615_vm6, %v9101_v8 }
 0x30a   :  { %6937 = vmatprep.subr.mxu1 %v9101_v8 }
 0x30c   :  { %6935 = vmatmul.mubr.msk.f32.vlgmr.msra.gmra.mrb[4].mxu1 %vm535_vm7, %v8066_v38  ;;  %v703_v39 = vpop.permute.xlu1 %702  ;;  %v955_v48 = vpop.permute.xlu0 %954 }
 0x30d   :  { %6938 = vmatpush3.xpose.msk.msra.mxu1 %vm535_vm7, %v703_v39  ;;  %6939 = vmatprep.mubr.msk.f32.mxu1 %vm7615_vm6, %v9101_v8 }
 0x30e   :  { %6942 = vmatprep.subr.mxu1 %v9101_v8 }
 0x310   :  { %v871_v42 = vpop.permute.xlu1 %870  ;;  %6940 = vmatmul.mubr.msk.f32.vlgmr.msra.gmra.mrb[6].mxu1 %vm535_vm7, %v8074_v40  ;;  %v1123_v53 = vpop.permute.xlu0 %1122 }
 0x311   :  { %6943 = vmatpush3.xpose.msk.msra.mxu1 %vm535_vm7, %v787_v41  ;;  %6944 = vmatprep.mubr.msk.f32.mxu1 %vm7615_vm6, %v9101_v8 }
 0x312   :  { %6947 = vmatprep.subr.mxu1 %v9101_v8 }
 0x314   :  { %v1039_v44 = vpop.permute.xlu1 %1038  ;;  %6945 = vmatmul.mubr.msk.f32.vlgmr.msra.gmra.mrb[8].mxu1 %vm535_vm7, %v8082_v43  ;;  %v8149_v22 = vpop.permute.xlu0 %1366 }
 0x315   :  { %6948 = vmatpush3.xpose.msk.msra.mxu1 %vm535_vm7, %v871_v42  ;;  %6949 = vmatprep.mubr.msk.f32.mxu1 %vm7615_vm6, %v9101_v8 }
 0x316   :  { %6952 = vmatprep.subr.mxu1 %v9101_v8 }
 0x318   :  { %v1289_v49 = vpop.permute.xlu1 %1288  ;;  %6950 = vmatmul.mubr.msk.f32.vlgmr.msra.gmra.mrb[10].mxu1 %vm535_vm7, %v8091_v46  ;;  %v8153_v0 = vpop.permute.xlu0 %1674 }
 0x319   :  { %6953 = vmatpush3.xpose.msk.msra.mxu1 %vm535_vm7, %v955_v48  ;;  %6954 = vmatprep.mubr.msk.f32.mxu1 %vm7615_vm6, %v9101_v8 }
 0x31a   :  { %6957 = vmatprep.subr.mxu1 %v9101_v8 }
 0x31c   :  { %v8103_v51 = vpop.permute.xlu1 %1443  ;;  %6955 = vmatmul.mubr.msk.f32.vlgmr.msra.gmra.mrb[12].mxu1 %vm535_vm7, %v8100_v50  ;;  %v8157_v28 = vpop.permute.xlu0 %1828 }
 0x31d   :  { %6958 = vmatpush3.xpose.msk.msra.mxu1 %vm535_vm7, %v1039_v44  ;;  %6959 = vmatprep.mubr.msk.f32.mxu1 %vm7615_vm6, %v9101_v8 }
 0x31e   :  { %6962 = vmatprep.subr.mxu1 %v9101_v8 }
 0x320   :  { %v1598_v54 = vpop.permute.xlu1 %1597  ;;  %6960 = vmatmul.mubr.msk.f32.vlgmr.msra.gmra.mrb[14].mxu1 %vm535_vm7, %v8111_v52  ;;  %v8161_v36 = vpop.permute.xlu0 %1999 }
 0x321   :  { %6963 = vmatpush3.xpose.msk.msra.mxu1 %vm535_vm7, %v1123_v53  ;;  %6988 = vmatpush3.msk.msra.mxu0 %vm274_vm3, %v1598_v54 }
 0x322   :  { %6964 = vmatprep.mubr.msk.f32.mxu1 %vm7615_vm6, %v9101_v8  ;;  %6967 = vmatprep.subr.mxu1 %v9101_v8 }
 0x323   :  { %6997 = vmatprep.subr.mxu0 %v9101_v8 }
 0x324   :  { %6965 = vmatmul.mubr.msk.f32.vlgmr.msra.gmra.mrb[16].mxu1 %vm535_vm7, %v8119_v55  ;;  %v8147_v21 = vpop.permute.xlu1 %1751 }
 0x325   :  { %6968 = vmatpush3.msk.msra.mxu1 %vm274_vm3, %v1289_v49  ;;  %6969 = vmatprep.mubr.msk.f32.mxu1 %vm7615_vm6, %v9101_v8 }
 0x326   :  { %6972 = vmatprep.subr.mxu1 %v9101_v8 }
 0x328   :  { %v8151_v24 = vpop.permute.xlu1 %1914 }
 0x32c   :  { %v8155_v25 = vpop.permute.xlu1 %1912 }
 0x330   :  { %v8159_v34 = vpop.permute.xlu1 %1520 }
 0x3db   :  { %v607_v56 = vpop.f32.mrb[2].mxu1 }
 0x3dc   :  { %v6931_v57 = vpop.f32.mrb[3].mxu1  ;;  %v1200_v58 = vsel %vm1199_vm8, %v607_v56, -inf }
 0x3dd   :  { %1201 = vmax.xlane.f32.xlu1 %v1200_v58 }
 0x3df   :  { %v691_v59 = vpop.f32.mrb[4].mxu1 }
 0x3e0   :  { %v6936_v60 = vpop.f32.mrb[5].mxu1  ;;  %v1203_v62 = vsel %vm1199_vm8, %v691_v59, -inf }
 0x3e1   :  { %1204 = vmax.xlane.f32.xlu0 %v1203_v62  ;;  %v8177_v62 = vrot.slane %v8074_v40, %v7973_v12 }
 0x3e3   :  { %v775_v63 = vpop.f32.mrb[6].mxu1 }
 0x3e4   :  { %v6941_v1 = vpop.f32.mrb[7].mxu1  ;;  %v1206_v3 = vsel %vm1199_vm8, %v775_v63, -inf }
 0x3e5   :  { %1207 = vmax.xlane.f32.xlu0 %v1206_v3 }
 0x3e7   :  { %v859_v4 = vpop.f32.mrb[8].mxu1 }
 0x3e8   :  { %v6946_v6 = vpop.f32.mrb[9].mxu1  ;;  %v1209_v2 = vsel %vm1199_vm8, %v859_v4, -inf }
 0x3e9   :  { %1210 = vmax.xlane.f32.xlu0 %v1209_v2 }
 0x3eb   :  { %v943_v9 = vpop.f32.mrb[10].mxu1 }
 0x3ec   :  { %v6951_v61 = vpop.f32.mrb[11].mxu1  ;;  %v1212_v10 = vsel %vm1199_vm8, %v943_v9, -inf }
 0x3ed   :  { %1213 = vmax.xlane.f32.xlu1 %v1212_v10 }
 0x3ef   :  { %v1027_v11 = vpop.f32.mrb[12].mxu1 }
 0x3f0   :  { %v6956_v7 = vpop.f32.mrb[13].mxu1  ;;  %v1215_v13 = vsel %vm1199_vm8, %v1027_v11, -inf }
 0x3f1   :  { %1216 = vmax.xlane.f32.xlu0 %v1215_v13 }
 0x3f3   :  { %v1111_v14 = vpop.f32.mrb[14].mxu1 }
 0x3f4   :  { %v6961_v15 = vpop.f32.mrb[15].mxu1  ;;  %v1218_v16 = vsel %vm1199_vm8, %v1111_v14, -inf }
 0x3f5   :  { %1219 = vmax.xlane.f32.xlu1 %v1218_v16 }
 0x3f7   :  { %v1195_v17 = vpop.f32.mrb[16].mxu1 }
 0x3f8   :  { %v6966_v18 = vpop.f32.mrb[17].mxu1  ;;  %v1221_v19 = vsel %vm1199_vm8, %v1195_v17, -inf }
 0x3f9   :  { %1222 = vmax.xlane.f32.xlu0 %v1221_v19 }
 0x406   :  { %2084 = vrot.lane.b32.xlu1 %v8011_v30, %s7617_s22 }
 0x40f   :  { %1997 = vrot.lane.b32.xlu0 %v8143_v20, %s7618_s23 }
 0x46a   :  { %v1202_v37 = vpop.xlane.xlu1 %1201 }
 0x46b   :  { %v1224_v38 = vsub.f32 %v607_v56, %v1202_v37 }
 0x46d   :  { %v1232_v39 = vmul.f32 1.442695, %v1224_v38 }
 0x46e   :  { %v1205_v41 = vpop.xlane.xlu0 %1204 }
 0x46f   :  { %7449 = vpow2.f32 %v1232_v39  ;;  %v1225_v42 = vsub.f32 %v691_v59, %v1205_v41 }
 0x471   :  { %v1234_v44 = vmul.f32 1.442695, %v1225_v42 }
 0x472   :  { %v1208_v48 = vpop.xlane.xlu0 %1207 }
 0x473   :  { %7451 = vpow2.f32 %v1234_v44  ;;  %v1226_v49 = vsub.f32 %v775_v63, %v1208_v48  ;;  %v8207_v48 = vrot.slane %v8091_v46, %v7973_v12  ;;  %v8223_v46 = vrot.slane %v8111_v52, %v7973_v12 }
 0x475   :  { %v1236_v53 = vmul.f32 1.442695, %v1226_v49  ;;  %v8211_v49 = vrot.slane %v8082_v43, %v7973_v12  ;;  %v8227_v43 = vrot.slane %v8100_v50, %v7973_v12 }
 0x476   :  { %v1211_v63 = vpop.xlane.xlu0 %1210 }
 0x477   :  { %7453 = vpow2.f32 %v1236_v53  ;;  %v1227_v1 = vsub.f32 %v859_v4, %v1211_v63  ;;  %v8237_v53 = vrot.slane %v8119_v55, %v7973_v12 }
 0x479   :  { %v8163_v54 = vpop.eup %7449  ;;  %v1238_v61 = vmul.f32 1.442695, %v1227_v1 }
 0x47a   :  { %v1248_v57 = vsel %vm1199_vm8, %v8163_v54, 0.0  ;;  %v1214_v3 = vpop.xlane.xlu1 %1213 }
 0x47b   :  { %1249 = vadd.xlane.f32.xlu1 %v1248_v57  ;;  %v1228_v2 = vsub.f32 %v943_v9, %v1214_v3  ;;  %7455 = vpow2.f32 %v1238_v61 }
 0x47d   :  { %v8167_v58 = vpop.eup %7451  ;;  %v1240_v15 = vmul.f32 1.442695, %v1228_v2 }
 0x47e   :  { %v1251_v56 = vsel %vm1199_vm8, %v8167_v58, 0.0  ;;  %v1217_v6 = vpop.xlane.xlu0 %1216 }
 0x47f   :  { %1252 = vadd.xlane.f32.xlu0 %v1251_v56  ;;  %v1229_v10 = vsub.f32 %v1027_v11, %v1217_v6  ;;  %7457 = vpow2.f32 %v1240_v15 }
 0x481   :  { %v8171_v60 = vpop.eup %7453  ;;  %v1242_v40 = vmul.f32 1.442695, %v1229_v10 }
 0x482   :  { %v1254_v59 = vsel %vm1199_vm8, %v8171_v60, 0.0  ;;  %v1220_v7 = vpop.xlane.xlu1 %1219 }
 0x483   :  { %1255 = vadd.xlane.f32.xlu1 %v1254_v59  ;;  %v1230_v16 = vsub.f32 %v1111_v14, %v1220_v7  ;;  %7459 = vpow2.f32 %v1242_v40 }
 0x485   :  { %v1244_v19 = vmul.f32 1.442695, %v1230_v16  ;;  %v8183_v38 = vpop.eup %7455 }
 0x486   :  { %v1223_v13 = vpop.xlane.xlu0 %1222  ;;  %v1257_v9 = vsel %vm1199_vm8, %v8183_v38, 0.0  ;;  %v8241_v52 = vpop.permute.xlu1 %2084 }
 0x487   :  { %v1231_v18 = vsub.f32 %v1195_v17, %v1223_v13  ;;  %7461 = vpow2.f32 %v1244_v19 }
 0x489   :  { %v1246_v37 = vmul.f32 1.442695, %v1231_v18  ;;  %v8185_v4 = vpop.eup %7457 }
 0x48a   :  { %v1260_v17 = vsel %vm1199_vm8, %v8185_v4, 0.0  ;;  %v8243_v50 = vpop.permute.xlu0 %1997 }
 0x48b   :  { %7463 = vpow2.f32 %v1246_v37 }
 0x48d   :  { %v8189_v11 = vpop.eup %7459 }
 0x48e   :  { %v1263_v39 = vsel %vm1199_vm8, %v8189_v11, 0.0 }
 0x491   :  { %v8191_v14 = vpop.eup %7461 }
 0x492   :  { %v1266_v42 = vsel %vm1199_vm8, %v8191_v14, 0.0 }
 0x494   :  { %2082 = vrot.lane.b32.xlu1 %v8177_v62, %s7618_s23 }
 0x495   :  { %2169 = vrot.lane.b32.xlu0 %v7996_v27, %s7617_s22  ;;  %v8197_v41 = vpop.eup %7463 }
 0x496   :  { %v1269_v44 = vsel %vm1199_vm8, %v8197_v41, 0.0 }
 0x4b4   :  { %1258 = vadd.xlane.f32.xlu0 %v1257_v9 }
 0x4b8   :  { %1261 = vadd.xlane.f32.xlu1 %v1260_v17  ;;  %1264 = vadd.xlane.f32.xlu0 %v1263_v39 }
 0x4bc   :  { %1267 = vadd.xlane.f32.xlu1 %v1266_v42  ;;  %1270 = vadd.xlane.f32.xlu0 %v1269_v44 }
 0x4cd   :  { %2254 = vrot.lane.b32.xlu1 %v8019_v31, %s7617_s22 }
 0x4d1   :  { %2252 = vrot.lane.b32.xlu1 %v8207_v48, %s7618_s23 }
 0x4d2   :  { %2167 = vrot.lane.b32.xlu0 %v8211_v49, %s7618_s23 }
 0x4d5   :  { %2424 = vrot.lane.b32.xlu1 %v8031_v33, %s7617_s22 }
 0x4d6   :  { %2339 = vrot.lane.b32.xlu0 %v8008_v29, %s7617_s22 }
 0x4d9   :  { %2422 = vrot.lane.b32.xlu1 %v8223_v46, %s7618_s23 }
 0x4da   :  { %2337 = vrot.lane.b32.xlu0 %v8227_v43, %s7618_s23 }
 0x4de   :  { %2509 = vrot.lane.b32.xlu0 %v8023_v32, %s7617_s22 }
 0x4e2   :  { %2507 = vrot.lane.b32.xlu0 %v8237_v53, %s7618_s23 }
 0x508   :  { %v1250_v57 = vpop.xlane.xlu1 %1249 }
 0x509   :  { %7465 = vrcp.f32 %v1250_v57 }
 0x50c   :  { %v1253_v56 = vpop.xlane.xlu0 %1252 }
 0x50d   :  { %7467 = vrcp.f32 %v1253_v56 }
 0x510   :  { %v1256_v59 = vpop.xlane.xlu1 %1255 }
 0x511   :  { %7469 = vrcp.f32 %v1256_v59 }
 0x513   :  { %v7466_v63 = vpop.eup %7465 }
 0x514   :  { %v1280_v1 = vmul.f32 %v7466_v63, %v8163_v54  ;;  %v2170_v54 = vpop.permute.xlu0 %2169 }
 0x516   :  { %6970 = vmatmul.mubr.msk.f32.vlgmr.msra.gmra.mrb[18].mxu1 %vm1290_vm9, %v1280_v1 }
 0x517   :  { %v7468_v55 = vpop.eup %7467  ;;  %6973 = vmatpush3.msk.msra.mxu1 %vm274_vm3, %v8149_v22  ;;  %6974 = vmatprep.mubr.msk.f32.mxu1 %vm7615_vm6, %v9101_v8 }
 0x518   :  { %6977 = vmatprep.subr.mxu1 %v9101_v8  ;;  %v1281_v3 = vmul.f32 %v7468_v55, %v8167_v58  ;;  %v2083_v58 = vpop.permute.xlu1 %2082 }
 0x51a   :  { %6975 = vmatmul.mubr.msk.f32.vlgmr.msra.gmra.mrb[20].mxu1 %vm1290_vm9, %v1281_v3 }
 0x51b   :  { %v7470_v6 = vpop.eup %7469  ;;  %6978 = vmatpush3.msk.msra.mxu1 %vm274_vm3, %v8103_v51  ;;  %6979 = vmatprep.mubr.msk.f32.mxu1 %vm7615_vm6, %v9101_v8 }
 0x51c   :  { %6982 = vmatprep.subr.mxu1 %v9101_v8  ;;  %v1282_v22 = vmul.f32 %v7470_v6, %v8171_v60 }
 0x51e   :  { %6980 = vmatmul.mubr.msk.f32.vlgmr.msra.gmra.mrb[22].mxu1 %vm1290_vm9, %v1282_v22 }
 0x51f   :  { %6983 = vmatpush3.msk.msra.mxu1 %vm274_vm3, %v8159_v34  ;;  %6984 = vmatprep.mubr.msk.f32.mxu1 %vm7615_vm6, %v9101_v8 }
 0x520   :  { %6992 = vmatprep.subr.mxu1 %v9101_v8 }
 0x541   :  { %v1259_v51 = vpop.xlane.xlu0 %1258 }
 0x542   :  { %7471 = vrcp.f32 %v1259_v51 }
 0x545   :  { %v1262_v2 = vpop.xlane.xlu1 %1261  ;;  %v1265_v61 = vpop.xlane.xlu0 %1264 }
 0x546   :  { %7473 = vrcp.f32 %v1262_v2 }
 0x547   :  { %7475 = vrcp.f32 %v1265_v61 }
 0x549   :  { %v1268_v10 = vpop.xlane.xlu1 %1267  ;;  %v1271_v60 = vpop.xlane.xlu0 %1270 }
 0x54a   :  { %7477 = vrcp.f32 %v1268_v10 }
 0x54b   :  { %7479 = vrcp.f32 %v1271_v60 }
 0x54c   :  { %v7472_v7 = vpop.eup %7471 }
 0x54d   :  { %v1283_v34 = vmul.f32 %v7472_v7, %v8183_v38  ;;  %v2168_v40 = vpop.permute.xlu0 %2167 }
 0x54f   :  { %6985 = vmatmul.mubr.msk.f32.vlgmr.msra.gmra.mrb[24].mxu1 %vm1290_vm9, %v1283_v34 }
 0x550   :  { %v7474_v13 = vpop.eup %7473  ;;  %6993 = vmatpush3.msk.msra.mxu1 %vm274_vm3, %v8153_v0  ;;  %6994 = vmatprep.mubr.msk.f32.mxu1 %vm7615_vm6, %v9101_v8 }
 0x551   :  { %v7476_v15 = vpop.eup %7475  ;;  %7002 = vmatprep.subr.mxu1 %v9101_v8  ;;  %v1284_v16 = vmul.f32 %v7474_v13, %v8185_v4  ;;  %v2255_v4 = vpop.permute.xlu1 %2254 }
 0x552   :  { %v1285_v18 = vmul.f32 %v7476_v15, %v8189_v11 }
 0x553   :  { %6990 = vmatmul.mubr.msk.f32.vlgmr.msra.gmra.mrb[2].mxu0 %vm1290_vm9, %v1284_v16 }
 0x554   :  { %v7478_v19 = vpop.eup %7477  ;;  %6995 = vmatmul.mubr.msk.f32.vlgmr.msra.gmra.mrb[26].mxu1 %vm1290_vm9, %v1285_v18  ;;  %6998 = vmatpush3.msk.msra.mxu0 %vm274_vm3, %v8147_v21  ;;  %v2340_v21 = vpop.permute.xlu0 %2339 }
 0x555   :  { %v7480_v0 = vpop.eup %7479  ;;  %7003 = vmatpush3.msk.msra.mxu1 %vm274_vm3, %v8157_v28  ;;  %6999 = vmatprep.mubr.msk.f32.mxu0 %vm7615_vm6, %v9101_v8  ;;  %v1286_v37 = vmul.f32 %v7478_v19, %v8191_v14  ;;  %v2253_v28 = vpop.permute.xlu1 %2252 }
 0x556   :  { %7004 = vmatprep.mubr.msk.f32.mxu1 %vm7615_vm6, %v9101_v8  ;;  %v1287_v38 = vmul.f32 %v7480_v0, %v8197_v41  ;;  %7007 = vmatprep.subr.mxu0 %v9101_v8 }
 0x557   :  { %7000 = vmatmul.mubr.msk.f32.vlgmr.msra.gmra.mrb[4].mxu0 %vm1290_vm9, %v1286_v37  ;;  %7012 = vmatprep.subr.mxu1 %v9101_v8 }
 0x558   :  { %7005 = vmatmul.mubr.msk.f32.vlgmr.msra.gmra.mrb[28].mxu1 %vm1290_vm9, %v1287_v38  ;;  %7009 = vmatprep.mubr.msk.f32.mxu0 %vm7615_vm6, %v9101_v8  ;;  %v2338_v9 = vpop.permute.xlu0 %2337 }
 0x559   :  { %7014 = vmatprep.mubr.msk.f32.mxu1 %vm7615_vm6, %v9101_v8 }
 0x55b   :  { %7008 = vmatpush3.xpose.msk.msra.mxu0 %vm535_vm7, %v8151_v24  ;;  %v2425_v24 = vpop.permute.xlu1 %2424 }
 0x55c   :  { %7013 = vmatpush3.xpose.msk.msra.mxu1 %vm535_vm7, %v8161_v36  ;;  %7017 = vmatprep.subr.mxu0 %v9101_v8 }
 0x55d   :  { %7022 = vmatprep.subr.mxu1 %v9101_v8 }
 0x55e   :  { %7010 = vmatmul.mubr.msk.f32.vlgmr.msra.gmra.mrb[6].mxu0 %vm535_vm7, %v8155_v25  ;;  %v2510_v25 = vpop.permute.xlu0 %2509 }
 0x55f   :  { %7015 = vmatmul.mubr.msk.f32.vlgmr.msra.gmra.mrb[30].mxu1 %vm535_vm7, %v8243_v50  ;;  %7018 = vmatpush3.xpose.msk.msra.mxu0 %vm535_vm7, %v8241_v52  ;;  %v2423_v36 = vpop.permute.xlu1 %2422 }
 0x560   :  { %7023 = vmatpush3.xpose.msk.msra.mxu1 %vm535_vm7, %v2170_v54  ;;  %7019 = vmatprep.mubr.msk.f32.mxu0 %vm7615_vm6, %v9101_v8 }
 0x561   :  { %7024 = vmatprep.mubr.msk.f32.mxu1 %vm7615_vm6, %v9101_v8  ;;  %7027 = vmatprep.subr.mxu0 %v9101_v8 }
 0x562   :  { %7020 = vmatmul.mubr.msk.f32.vlgmr.msra.gmra.mrb[8].mxu0 %vm535_vm7, %v2083_v58  ;;  %7032 = vmatprep.subr.mxu1 %v9101_v8  ;;  %v2508_v11 = vpop.permute.xlu0 %2507 }
 0x563   :  { %7025 = vmatmul.mubr.msk.f32.vlgmr.msra.gmra.mrb[32].mxu1 %vm535_vm7, %v2168_v40  ;;  %7028 = vmatpush3.xpose.msk.msra.mxu0 %vm535_vm7, %v2255_v4 }
 0x564   :  { %7033 = vmatpush3.xpose.msk.msra.mxu1 %vm535_vm7, %v2340_v21  ;;  %7029 = vmatprep.mubr.msk.f32.mxu0 %vm7615_vm6, %v9101_v8 }
 0x565   :  { %7034 = vmatprep.mubr.msk.f32.mxu1 %vm7615_vm6, %v9101_v8  ;;  %7037 = vmatprep.subr.mxu0 %v9101_v8 }
 0x566   :  { %7030 = vmatmul.mubr.msk.f32.vlgmr.msra.gmra.mrb[10].mxu0 %vm535_vm7, %v2253_v28  ;;  %7042 = vmatprep.subr.mxu1 %v9101_v8 }
 0x567   :  { %7035 = vmatmul.mubr.msk.f32.vlgmr.msra.gmra.mrb[34].mxu1 %vm535_vm7, %v2338_v9  ;;  %7038 = vmatpush3.xpose.msk.msra.mxu0 %vm535_vm7, %v2425_v24 }
 0x568   :  { %7043 = vmatpush3.xpose.msk.msra.mxu1 %vm535_vm7, %v2510_v25  ;;  %7039 = vmatprep.mubr.msk.f32.mxu0 %vm7615_vm6, %v9101_v8 }
 0x569   :  { %7044 = vmatprep.mubr.msk.f32.mxu1 %vm7615_vm6, %v9101_v8  ;;  %7047 = vmatprep.subr.mxu0 %v9101_v8 }
 0x56a   :  { %7040 = vmatmul.mubr.msk.f32.vlgmr.msra.gmra.mrb[12].mxu0 %vm535_vm7, %v2423_v36  ;;  %7052 = vmatprep.subr.mxu1 %v9101_v8 }
 0x56b   :  { %7045 = vmatmul.mubr.msk.f32.vlgmr.msra.gmra.mrb[36].mxu1 %vm535_vm7, %v2508_v11  ;;  %7049 = vmatprep.mubr.msk.f32.mxu0 %vm7615_vm6, %v9101_v8 }
 0x56c   :  { %7054 = vmatprep.mubr.msk.f32.mxu1 %vm7615_vm6, %v9101_v8 }
 0x5e9   :  { %v8340_v14 = vpop.f32.mrb[18].mxu1 }
 0x5ea   :  { %v6971_v17 = vpop.f32.mrb[19].mxu1 }
 0x5ed   :  { %v8342_v39 = vpop.f32.mrb[20].mxu1 }
 0x5ee   :  { %v6976_v41 = vpop.f32.mrb[21].mxu1 }
 0x5f1   :  { %v8344_v42 = vpop.f32.mrb[22].mxu1 }
 0x5f2   :  { %v6981_v44 = vpop.f32.mrb[23].mxu1 }
 0x622   :  { %v8346_v52 = vpop.f32.mrb[24].mxu1 }
 0x623   :  { %v6986_v50 = vpop.f32.mrb[25].mxu1 }
 0x626   :  { %v8348_v57 = vpop.f32.mrb[2].mxu0 }
 0x627   :  { %v8350_v56 = vpop.f32.mrb[26].mxu1  ;;  %v6991_v59 = vpop.f32.mrb[3].mxu0 }
 0x628   :  { %v6996_v63 = vpop.f32.mrb[27].mxu1 }
 0x62a   :  { %v8352_v1 = vpop.f32.mrb[4].mxu0 }
 0x62b   :  { %9114 = vst [vmem:[#allocation7_spill] sm:$0xff] %v8352_v1  ;;  %v8354_v55 = vpop.f32.mrb[28].mxu1  ;;  %v7001_v3 = vpop.f32.mrb[5].mxu0 }
 0x62c   :  { %9115 = vst [vmem:[#allocation8_spill] sm:$0xff] %v8354_v55  ;;  %v7006_v6 = vpop.f32.mrb[29].mxu1 }
 0x631   :  { %v1986_v22 = vpop.f32.mrb[6].mxu0 }
 0x632   :  { %v2071_v54 = vpop.f32.mrb[30].mxu1  ;;  %v7011_v58 = vpop.f32.mrb[7].mxu0  ;;  %v2585_v51 = vsel %vm1199_vm8, %v1986_v22, -inf }
 0x633   :  { %v7016_v2 = vpop.f32.mrb[31].mxu1  ;;  %2586 = vmax.xlane.f32.xlu1 %v2585_v51  ;;  %v2588_v61 = vsel %vm1199_vm8, %v2071_v54, -inf }
 0x634   :  { %2589 = vmax.xlane.f32.xlu0 %v2588_v61 }
 0x635   :  { %v2156_v10 = vpop.f32.mrb[8].mxu0 }
 0x636   :  { %v2241_v60 = vpop.f32.mrb[32].mxu1  ;;  %v7021_v7 = vpop.f32.mrb[9].mxu0  ;;  %v2591_v34 = vsel %vm1199_vm8, %v2156_v10, -inf }
 0x637   :  { %v7026_v13 = vpop.f32.mrb[33].mxu1  ;;  %v2594_v0 = vsel %vm1199_vm8, %v2241_v60, -inf }
 0x638   :  { %2592 = vmax.xlane.f32.xlu0 %v2591_v34 }
 0x639   :  { %v2326_v15 = vpop.f32.mrb[10].mxu0 }
 0x63a   :  { %v2411_v16 = vpop.f32.mrb[34].mxu1  ;;  %v7031_v40 = vpop.f32.mrb[11].mxu0  ;;  %v2597_v18 = vsel %vm1199_vm8, %v2326_v15, -inf }
 0x63b   :  { %v7036_v19 = vpop.f32.mrb[35].mxu1  ;;  %2598 = vmax.xlane.f32.xlu1 %v2597_v18  ;;  %v2600_v9 = vsel %vm1199_vm8, %v2411_v16, -inf }
 0x63c   :  { %2595 = vmax.xlane.f32.xlu0 %v2594_v0 }
 0x63d   :  { %v2496_v37 = vpop.f32.mrb[12].mxu0 }
 0x63e   :  { %v8361_v38 = vpop.f32.mrb[36].mxu1  ;;  %v7041_v4 = vpop.f32.mrb[13].mxu0  ;;  %v2603_v21 = vsel %vm1199_vm8, %v2496_v37, -inf }
 0x63f   :  { %v7046_v28 = vpop.f32.mrb[37].mxu1  ;;  %2604 = vmax.xlane.f32.xlu1 %v2603_v21  ;;  %v2606_v24 = vsel %vm1199_vm8, %v8361_v38, -inf }
 0x640   :  { %2601 = vmax.xlane.f32.xlu0 %v2600_v9 }
 0x644   :  { %2607 = vmax.xlane.f32.xlu0 %v2606_v24 }
 0x650   :  { %2673 = vrot.lane.b32.xlu1 %v7981_v23, %s7619_s24 }
 0x654   :  { %2827 = vrot.lane.b32.xlu1 %v8011_v30, %s7619_s24 }
 0x658   :  { %2904 = vrot.lane.b32.xlu1 %v7996_v27, %s7619_s24 }
 0x65a   :  { %2750 = vrot.lane.b32.xlu0 %v7993_v26, %s7619_s24 }
 0x65c   :  { %2981 = vrot.lane.b32.xlu1 %v8019_v31, %s7619_s24 }
 0x65e   :  { %3058 = vrot.lane.b32.xlu0 %v8008_v29, %s7619_s24 }
 0x660   :  { %3135 = vrot.lane.b32.xlu1 %v8031_v33, %s7619_s24 }
 0x662   :  { %3212 = vrot.lane.b32.xlu0 %v8023_v32, %s7619_s24 }
 0x664   :  { %3291 = vrot.lane.b32.xlu1 %v7981_v23, %s7620_s25 }
 0x666   :  { %3369 = vrot.lane.b32.xlu0 %v7993_v26, %s7620_s25 }
 0x668   :  { %3289 = vrot.lane.b32.xlu1 %v8054_v35, %s7621_s3 }
 0x66a   :  { %3367 = vrot.lane.b32.xlu0 %v8143_v20, %s7621_s3 }
 0x66c   :  { %3447 = vrot.lane.b32.xlu1 %v8011_v30, %s7620_s25 }
 0x66e   :  { %3525 = vrot.lane.b32.xlu0 %v7996_v27, %s7620_s25 }
 0x670   :  { %3445 = vrot.lane.b32.xlu1 %v8177_v62, %s7621_s3 }
 0x6c0   :  { %v2587_v25 = vpop.xlane.xlu1 %2586 }
 0x6c1   :  { %v2609_v36 = vsub.f32 %v1986_v22, %v2587_v25  ;;  %v2590_v11 = vpop.xlane.xlu0 %2589 }
 0x6c2   :  { %v2610_v17 = vsub.f32 %v2071_v54, %v2590_v11 }
 0x6c3   :  { %v2617_v41 = vmul.f32 1.442695, %v2609_v36 }
 0x6c4   :  { %v2619_v44 = vmul.f32 1.442695, %v2610_v17 }
 0x6c5   :  { %7481 = vpow2.f32 %v2617_v41  ;;  %v2593_v50 = vpop.xlane.xlu0 %2592 }
 0x6c6   :  { %7483 = vpow2.f32 %v2619_v44  ;;  %v2611_v59 = vsub.f32 %v2156_v10, %v2593_v50 }
 0x6c8   :  { %v2621_v63 = vmul.f32 1.442695, %v2611_v59  ;;  %v2599_v3 = vpop.xlane.xlu1 %2598 }
 0x6c9   :  { %v2613_v6 = vsub.f32 %v2326_v15, %v2599_v3  ;;  %v2596_v58 = vpop.xlane.xlu0 %2595 }
 0x6ca   :  { %7485 = vpow2.f32 %v2621_v63  ;;  %v2612_v51 = vsub.f32 %v2241_v60, %v2596_v58 }
 0x6cb   :  { %v2625_v2 = vmul.f32 1.442695, %v2613_v6 }
 0x6cc   :  { %v2623_v61 = vmul.f32 1.442695, %v2612_v51  ;;  %v2605_v7 = vpop.xlane.xlu1 %2604 }
 0x6cd   :  { %7487 = vpow2.f32 %v2625_v2  ;;  %v2615_v34 = vsub.f32 %v2496_v37, %v2605_v7  ;;  %v2602_v22 = vpop.xlane.xlu0 %2601 }
 0x6ce   :  { %7489 = vpow2.f32 %v2623_v61  ;;  %v2614_v54 = vsub.f32 %v2411_v16, %v2602_v22 }
 0x6cf   :  { %v8389_v13 = vpop.eup %7481  ;;  %v2629_v40 = vmul.f32 1.442695, %v2615_v34 }
 0x6d0   :  { %v8391_v18 = vpop.eup %7483  ;;  %v2627_v10 = vmul.f32 1.442695, %v2614_v54  ;;  %v2674_v19 = vpop.permute.xlu1 %2673  ;;  %v2633_v15 = vsel %vm1199_vm8, %v8389_v13, 0.0 }
 0x6d1   :  { %7491 = vpow2.f32 %v2629_v40  ;;  %v2608_v60 = vpop.xlane.xlu0 %2607  ;;  %2634 = vadd.xlane.f32.xlu1 %v2633_v15  ;;  %7048 = vmatpush3.msk.msra.mxu0 %vm274_vm3, %v2674_v19  ;;  %v2636_v0 = vsel %vm1199_vm8, %v8391_v18, 0.0 }
 0x6d2   :  { %7493 = vpow2.f32 %v2627_v10  ;;  %v2616_v16 = vsub.f32 %v8361_v38, %v2608_v60  ;;  %2637 = vadd.xlane.f32.xlu0 %v2636_v0  ;;  %7057 = vmatprep.subr.mxu0 %v9101_v8 }
 0x6d4   :  { %v8400_v37 = vpop.eup %7485  ;;  %v2631_v4 = vmul.f32 1.442695, %v2616_v16  ;;  %v2828_v59 = vpop.permute.xlu1 %2827 }
 0x6d5   :  { %v2751_v21 = vpop.permute.xlu0 %2750  ;;  %v2639_v28 = vsel %vm1199_vm8, %v8400_v37, 0.0 }
 0x6d6   :  { %7495 = vpow2.f32 %v2631_v4  ;;  %2640 = vadd.xlane.f32.xlu1 %v2639_v28  ;;  %7053 = vmatpush3.msk.msra.mxu1 %vm274_vm3, %v2751_v21 }
 0x6d7   :  { %v8405_v9 = vpop.eup %7487  ;;  %7062 = vmatprep.subr.mxu1 %v9101_v8 }
 0x6d8   :  { %v8408_v24 = vpop.eup %7489  ;;  %v2645_v38 = vsel %vm1199_vm8, %v8405_v9, 0.0  ;;  %v2905_v63 = vpop.permute.xlu1 %2904 }
 0x6d9   :  { %v2642_v25 = vsel %vm1199_vm8, %v8408_v24, 0.0  ;;  %v3059_v58 = vpop.permute.xlu0 %3058 }
 0x6da   :  { %2646 = vadd.xlane.f32.xlu1 %v2645_v38  ;;  %2643 = vadd.xlane.f32.xlu0 %v2642_v25 }
 0x6db   :  { %v8414_v36 = vpop.eup %7491 }
 0x6dc   :  { %v8416_v11 = vpop.eup %7493  ;;  %v2651_v17 = vsel %vm1199_vm8, %v8414_v36, 0.0  ;;  %v2982_v3 = vpop.permute.xlu1 %2981 }
 0x6dd   :  { %v2648_v41 = vsel %vm1199_vm8, %v8416_v11, 0.0  ;;  %v8464_v2 = vpop.permute.xlu0 %3212 }
 0x6de   :  { %2652 = vadd.xlane.f32.xlu1 %v2651_v17  ;;  %2649 = vadd.xlane.f32.xlu0 %v2648_v41 }
 0x6e0   :  { %v8422_v44 = vpop.eup %7495  ;;  %v3136_v6 = vpop.permute.xlu1 %3135 }
 0x6e1   :  { %v2654_v50 = vsel %vm1199_vm8, %v8422_v44, 0.0 }
 0x6e2   :  { %2655 = vadd.xlane.f32.xlu0 %v2654_v50 }
 0x6e4   :  { %v8462_v51 = vpop.permute.xlu1 %3291 }
 0x6e8   :  { %v8466_v61 = vpop.permute.xlu1 %3289 }
 0x6ec   :  { %v8470_v7 = vpop.permute.xlu1 %3447 }
 0x6ef   :  { %3603 = vrot.lane.b32.xlu1 %v8019_v31, %s7620_s25 }
 0x6f0   :  { %v8474_v22 = vpop.permute.xlu1 %3445 }
 0x6f3   :  { %3601 = vrot.lane.b32.xlu1 %v8207_v48, %s7621_s3 }
 0x6f7   :  { %3759 = vrot.lane.b32.xlu1 %v8031_v33, %s7620_s25 }
 0x6f8   :  { %3523 = vrot.lane.b32.xlu0 %v8211_v49, %s7621_s3 }
 0x6fb   :  { %3757 = vrot.lane.b32.xlu1 %v8223_v46, %s7621_s3 }
 0x6fc   :  { %3681 = vrot.lane.b32.xlu0 %v8008_v29, %s7620_s25 }
 0x6ff   :  { %4001 = vrot.lane.b32.xlu1 %v7981_v23, %s7622_s26 }
 0x700   :  { %3679 = vrot.lane.b32.xlu0 %v8227_v43, %s7621_s3 }
 0x703   :  { %4155 = vrot.lane.b32.xlu1 %v8011_v30, %s7622_s26 }
 0x704   :  { %3837 = vrot.lane.b32.xlu0 %v8023_v32, %s7620_s25 }
 0x707   :  { %4232 = vrot.lane.b32.xlu1 %v7996_v27, %s7622_s26 }
 0x708   :  { %3835 = vrot.lane.b32.xlu0 %v8237_v53, %s7621_s3 }
 0x70b   :  { %4309 = vrot.lane.b32.xlu1 %v8019_v31, %s7622_s26 }
 0x70c   :  { %4078 = vrot.lane.b32.xlu0 %v7993_v26, %s7622_s26 }
 0x70f   :  { %4463 = vrot.lane.b32.xlu1 %v8031_v33, %s7622_s26 }
 0x710   :  { %4386 = vrot.lane.b32.xlu0 %v8008_v29, %s7622_s26 }
 0x713   :  { %4619 = vrot.lane.b32.xlu1 %v7981_v23, %s7623_s27 }
 0x714   :  { %4540 = vrot.lane.b32.xlu0 %v8023_v32, %s7622_s26 }
 0x717   :  { %4617 = vrot.lane.b32.xlu1 %v8054_v35, %s7624_s28  ;;  %v8468_v35 = vpop.permute.xlu0 %3369 }
 0x718   :  { %4697 = vrot.lane.b32.xlu0 %v7993_v26, %s7623_s27 }
 0x71b   :  { %4775 = vrot.lane.b32.xlu1 %v8011_v30, %s7623_s27  ;;  %v8472_v34 = vpop.permute.xlu0 %3367 }
 0x71c   :  { %4695 = vrot.lane.b32.xlu0 %v8143_v20, %s7624_s28 }
 0x71f   :  { %v8476_v20 = vpop.permute.xlu0 %3525 }
 0x75e   :  { %v2635_v54 = vpop.xlane.xlu1 %2634 }
 0x75f   :  { %7497 = vrcp.f32 %v2635_v54  ;;  %v2638_v40 = vpop.xlane.xlu0 %2637 }
 0x760   :  { %7499 = vrcp.f32 %v2638_v40 }
 0x763   :  { %v2641_v10 = vpop.xlane.xlu1 %2640 }
 0x764   :  { %7501 = vrcp.f32 %v2641_v10 }
 0x767   :  { %v2647_v19 = vpop.xlane.xlu1 %2646  ;;  %v2644_v15 = vpop.xlane.xlu0 %2643 }
 0x768   :  { %7503 = vrcp.f32 %v2647_v19 }
 0x769   :  { %v7498_v60 = vpop.eup %7497  ;;  %7505 = vrcp.f32 %v2644_v15 }
 0x76a   :  { %v7500_v0 = vpop.eup %7499  ;;  %v2665_v16 = vmul.f32 %v7498_v60, %v8389_v13 }
 0x76b   :  { %v2653_v4 = vpop.xlane.xlu1 %2652  ;;  %v2650_v21 = vpop.xlane.xlu0 %2649  ;;  %v2666_v28 = vmul.f32 %v7500_v0, %v8391_v18 }
 0x76c   :  { %7507 = vrcp.f32 %v2653_v4  ;;  %7050 = vmatmul.mubr.msk.f32.vlgmr.msra.gmra.mrb[14].mxu0 %vm1290_vm9, %v2665_v16 }
 0x76d   :  { %7509 = vrcp.f32 %v2650_v21  ;;  %7055 = vmatmul.mubr.msk.f32.vlgmr.msra.gmra.mrb[38].mxu1 %vm1290_vm9, %v2666_v28  ;;  %7058 = vmatpush3.msk.msra.mxu0 %vm274_vm3, %v2828_v59 }
 0x76e   :  { %v7502_v38 = vpop.eup %7501  ;;  %7063 = vmatpush3.msk.msra.mxu1 %vm274_vm3, %v2905_v63  ;;  %7059 = vmatprep.mubr.msk.f32.mxu0 %vm7615_vm6, %v9101_v8 }
 0x76f   :  { %v2656_v25 = vpop.xlane.xlu0 %2655  ;;  %7067 = vmatprep.subr.mxu0 %v9101_v8  ;;  %v2667_v13 = vmul.f32 %v7502_v38, %v8400_v37  ;;  %7064 = vmatprep.mubr.msk.f32.mxu1 %vm7615_vm6, %v9101_v8  ;;  %v3604_v50 = vpop.permute.xlu1 %3603 }
 0x770   :  { %7511 = vrcp.f32 %v2656_v25  ;;  %7072 = vmatprep.subr.mxu1 %v9101_v8 }
 0x771   :  { %7060 = vmatmul.mubr.msk.f32.vlgmr.msra.gmra.mrb[16].mxu0 %vm1290_vm9, %v2667_v13 }
 0x772   :  { %v7504_v18 = vpop.eup %7503  ;;  %7068 = vmatpush3.msk.msra.mxu0 %vm274_vm3, %v2982_v3  ;;  %7069 = vmatprep.mubr.msk.f32.mxu0 %vm7615_vm6, %v9101_v8 }
 0x773   :  { %v7506_v17 = vpop.eup %7505  ;;  %v3524_v41 = vpop.permute.xlu0 %3523  ;;  %7077 = vmatprep.subr.mxu0 %v9101_v8  ;;  %v2669_v37 = vmul.f32 %v7504_v18, %v8405_v9 }
 0x774   :  { %v2668_v59 = vmul.f32 %v7506_v17, %v8408_v24  ;;  %v3602_v40 = vpop.permute.xlu1 %3601 }
 0x775   :  { %7070 = vmatmul.mubr.msk.f32.vlgmr.msra.gmra.mrb[18].mxu0 %vm1290_vm9, %v2669_v37 }
 0x776   :  { %v7508_v63 = vpop.eup %7507  ;;  %7065 = vmatmul.mubr.msk.f32.vlgmr.msra.gmra.mrb[40].mxu1 %vm1290_vm9, %v2668_v59  ;;  %7078 = vmatpush3.msk.msra.mxu0 %vm274_vm3, %v3136_v6 }
 0x777   :  { %v7510_v3 = vpop.eup %7509  ;;  %7073 = vmatpush3.msk.msra.mxu1 %vm274_vm3, %v3059_v58  ;;  %7074 = vmatprep.mubr.msk.f32.mxu1 %vm7615_vm6, %v9101_v8  ;;  %v2671_v54 = vmul.f32 %v7508_v63, %v8414_v36  ;;  %v3682_v24 = vpop.permute.xlu0 %3681 }
 0x778   :  { %7079 = vmatprep.mubr.msk.f32.mxu0 %vm7615_vm6, %v9101_v8  ;;  %7082 = vmatprep.subr.mxu1 %v9101_v8  ;;  %v2670_v9 = vmul.f32 %v7510_v3, %v8416_v11  ;;  %v3760_v58 = vpop.permute.xlu1 %3759 }
 0x779   :  { %7080 = vmatmul.mubr.msk.f32.vlgmr.msra.gmra.mrb[20].mxu0 %vm1290_vm9, %v2671_v54  ;;  %7087 = vmatprep.subr.mxu0 %v9101_v8 }
 0x77a   :  { %v7512_v6 = vpop.eup %7511  ;;  %7075 = vmatmul.mubr.msk.f32.vlgmr.msra.gmra.mrb[42].mxu1 %vm1290_vm9, %v2670_v9  ;;  %7089 = vmatprep.mubr.msk.f32.mxu0 %vm7615_vm6, %v9101_v8 }
 0x77b   :  { %7083 = vmatpush3.msk.msra.mxu1 %vm274_vm3, %v8464_v2  ;;  %7084 = vmatprep.mubr.msk.f32.mxu1 %vm7615_vm6, %v9101_v8  ;;  %v2672_v36 = vmul.f32 %v7512_v6, %v8422_v44  ;;  %v3680_v11 = vpop.permute.xlu0 %3679 }
 0x77c   :  { %7092 = vmatprep.subr.mxu1 %v9101_v8 }
 0x77d   :  { %7088 = vmatpush3.xpose.msk.msra.mxu0 %vm535_vm7, %v8462_v51  ;;  %v3758_v51 = vpop.permute.xlu1 %3757 }
 0x77e   :  { %7085 = vmatmul.mubr.msk.f32.vlgmr.msra.gmra.mrb[44].mxu1 %vm1290_vm9, %v2672_v36  ;;  %7097 = vmatprep.subr.mxu0 %v9101_v8 }
 0x77f   :  { %7094 = vmatprep.mubr.msk.f32.mxu1 %vm7615_vm6, %v9101_v8  ;;  %v3838_v44 = vpop.permute.xlu0 %3837 }
 0x780   :  { %7090 = vmatmul.mubr.msk.f32.vlgmr.msra.gmra.mrb[22].mxu0 %vm535_vm7, %v8466_v61 }
 0x781   :  { %7098 = vmatpush3.xpose.msk.msra.mxu0 %vm535_vm7, %v8470_v7  ;;  %7099 = vmatprep.mubr.msk.f32.mxu0 %vm7615_vm6, %v9101_v8  ;;  %v4002_v61 = vpop.permute.xlu1 %4001 }
 0x782   :  { %7093 = vmatpush3.xpose.msk.msra.mxu1 %vm535_vm7, %v8468_v35  ;;  %7107 = vmatprep.subr.mxu0 %v9101_v8 }
 0x783   :  { %7102 = vmatprep.subr.mxu1 %v9101_v8  ;;  %v3836_v2 = vpop.permute.xlu0 %3835 }
 0x784   :  { %7100 = vmatmul.mubr.msk.f32.vlgmr.msra.gmra.mrb[24].mxu0 %vm535_vm7, %v8474_v22 }
 0x785   :  { %7095 = vmatmul.mubr.msk.f32.vlgmr.msra.gmra.mrb[46].mxu1 %vm535_vm7, %v8472_v34  ;;  %7108 = vmatpush3.xpose.msk.msra.mxu0 %vm535_vm7, %v3604_v50 }
 0x786   :  { %7103 = vmatpush3.xpose.msk.msra.mxu1 %vm535_vm7, %v8476_v20  ;;  %7104 = vmatprep.mubr.msk.f32.mxu1 %vm7615_vm6, %v9101_v8 }
 0x787   :  { %7109 = vmatprep.mubr.msk.f32.mxu0 %vm7615_vm6, %v9101_v8  ;;  %7117 = vmatprep.subr.mxu0 %v9101_v8  ;;  %v4079_v35 = vpop.permute.xlu0 %4078 }
 0x788   :  { %7110 = vmatmul.mubr.msk.f32.vlgmr.msra.gmra.mrb[26].mxu0 %vm535_vm7, %v3602_v40  ;;  %7112 = vmatprep.subr.mxu1 %v9101_v8 }
 0x789   :  { %7105 = vmatmul.mubr.msk.f32.vlgmr.msra.gmra.mrb[48].mxu1 %vm535_vm7, %v3524_v41  ;;  %7118 = vmatpush3.xpose.msk.msra.mxu0 %vm535_vm7, %v3760_v58 }
 0x78a   :  { %7113 = vmatpush3.xpose.msk.msra.mxu1 %vm535_vm7, %v3682_v24  ;;  %7114 = vmatprep.mubr.msk.f32.mxu1 %vm7615_vm6, %v9101_v8 }
 0x78b   :  { %7119 = vmatprep.mubr.msk.f32.mxu0 %vm7615_vm6, %v9101_v8  ;;  %7127 = vmatprep.subr.mxu0 %v9101_v8 }
 0x78c   :  { %7120 = vmatmul.mubr.msk.f32.vlgmr.msra.gmra.mrb[28].mxu0 %vm535_vm7, %v3758_v51  ;;  %7122 = vmatprep.subr.mxu1 %v9101_v8 }
 0x78d   :  { %7115 = vmatmul.mubr.msk.f32.vlgmr.msra.gmra.mrb[50].mxu1 %vm535_vm7, %v3680_v11  ;;  %7128 = vmatpush3.msk.msra.mxu0 %vm274_vm3, %v4002_v61 }
 0x78e   :  { %7123 = vmatpush3.xpose.msk.msra.mxu1 %vm535_vm7, %v3838_v44  ;;  %7124 = vmatprep.mubr.msk.f32.mxu1 %vm7615_vm6, %v9101_v8 }
 0x78f   :  { %7132 = vmatprep.subr.mxu1 %v9101_v8  ;;  %7129 = vmatprep.mubr.msk.f32.mxu0 %vm7615_vm6, %v9101_v8 }
 0x790   :  { %7137 = vmatprep.subr.mxu0 %v9101_v8 }
 0x791   :  { %7125 = vmatmul.mubr.msk.f32.vlgmr.msra.gmra.mrb[52].mxu1 %vm535_vm7, %v3836_v2 }
 0x792   :  { %7133 = vmatpush3.msk.msra.mxu1 %vm274_vm3, %v4079_v35  ;;  %7134 = vmatprep.mubr.msk.f32.mxu1 %vm7615_vm6, %v9101_v8 }
 0x793   :  { %7142 = vmatprep.subr.mxu1 %v9101_v8 }
 0x83f   :  { %v8574_v7 = vpop.f32.mrb[14].mxu0 }
 0x840   :  { %v8576_v34 = vpop.f32.mrb[38].mxu1  ;;  %v7051_v22 = vpop.f32.mrb[15].mxu0 }
 0x841   :  { %v7056_v20 = vpop.f32.mrb[39].mxu1 }
 0x844   :  { %v8578_v10 = vpop.f32.mrb[16].mxu0 }
 0x845   :  { %v7061_v19 = vpop.f32.mrb[17].mxu0 }
 0x848   :  { %v8580_v15 = vpop.f32.mrb[18].mxu0 }
 0x849   :  { %v8582_v60 = vpop.f32.mrb[40].mxu1  ;;  %v7071_v0 = vpop.f32.mrb[19].mxu0 }
 0x84a   :  { %v7066_v16 = vpop.f32.mrb[41].mxu1  ;;  %v8608_v0 = vpop.permute.xlu1 %4155 }
 0x84c   :  { %v8584_v4 = vpop.f32.mrb[20].mxu0 }
 0x84d   :  { %v8586_v21 = vpop.f32.mrb[42].mxu1  ;;  %v7081_v28 = vpop.f32.mrb[21].mxu0 }
 0x84e   :  { %v7076_v38 = vpop.f32.mrb[43].mxu1  ;;  %v8610_v16 = vpop.permute.xlu1 %4232 }
 0x851   :  { %v8588_v25 = vpop.f32.mrb[44].mxu1 }
 0x852   :  { %v7086_v13 = vpop.f32.mrb[45].mxu1  ;;  %v8612_v28 = vpop.permute.xlu1 %4309 }
 0x853   :  { %v3363_v18 = vpop.f32.mrb[22].mxu0  ;;  %v8616_v13 = vpop.permute.xlu0 %4386 }
 0x854   :  { %v7091_v17 = vpop.f32.mrb[23].mxu0  ;;  %v3913_v41 = vsel %vm1199_vm8, %v3363_v18, -inf }
 0x855   :  { %3914 = vmax.xlane.f32.xlu1 %v3913_v41 }
 0x856   :  { %v8614_v38 = vpop.permute.xlu1 %4463 }
 0x857   :  { %v3519_v37 = vpop.f32.mrb[24].mxu0  ;;  %v8620_v41 = vpop.permute.xlu0 %4540 }
 0x858   :  { %v3441_v50 = vpop.f32.mrb[46].mxu1  ;;  %v7101_v59 = vpop.f32.mrb[25].mxu0  ;;  %v3919_v36 = vsel %vm1199_vm8, %v3519_v37, -inf }
 0x859   :  { %v7096_v63 = vpop.f32.mrb[47].mxu1  ;;  %v3916_v3 = vsel %vm1199_vm8, %v3441_v50, -inf }
 0x85a   :  { %3917 = vmax.xlane.f32.xlu0 %v3916_v3  ;;  %v8618_v17 = vpop.permute.xlu1 %4619 }
 0x85b   :  { %v3675_v54 = vpop.f32.mrb[26].mxu0 }
 0x85c   :  { %v3597_v9 = vpop.f32.mrb[48].mxu1  ;;  %v7111_v24 = vpop.f32.mrb[27].mxu0  ;;  %v3925_v6 = vsel %vm1199_vm8, %v3675_v54, -inf }
 0x85d   :  { %v7106_v40 = vpop.f32.mrb[49].mxu1  ;;  %3926 = vmax.xlane.f32.xlu1 %v3925_v6  ;;  %v3922_v61 = vsel %vm1199_vm8, %v3597_v9, -inf }
 0x85e   :  { %3920 = vmax.xlane.f32.xlu0 %v3919_v36  ;;  %v8622_v59 = vpop.permute.xlu1 %4617 }
 0x85f   :  { %v8594_v11 = vpop.f32.mrb[28].mxu0 }
 0x860   :  { %v3753_v58 = vpop.f32.mrb[50].mxu1  ;;  %v7121_v44 = vpop.f32.mrb[29].mxu0  ;;  %v3931_v51 = vsel %vm1199_vm8, %v8594_v11, -inf }
 0x861   :  { %v7116_v2 = vpop.f32.mrb[51].mxu1  ;;  %3932 = vmax.xlane.f32.xlu1 %v3931_v51  ;;  %v3928_v20 = vsel %vm1199_vm8, %v3753_v58, -inf }
 0x862   :  { %3923 = vmax.xlane.f32.xlu0 %v3922_v61  ;;  %v8626_v63 = vpop.permute.xlu1 %4775 }
 0x864   :  { %v8599_v35 = vpop.f32.mrb[52].mxu1 }
 0x865   :  { %v7126_v22 = vpop.f32.mrb[53].mxu1  ;;  %v3934_v19 = vsel %vm1199_vm8, %v8599_v35, -inf }
 0x866   :  { %3929 = vmax.xlane.f32.xlu0 %v3928_v20 }
 0x86a   :  { %3935 = vmax.xlane.f32.xlu0 %v3934_v19 }
 0x872   :  { %4773 = vrot.lane.b32.xlu1 %v8177_v62, %s7624_s28  ;;  %v8624_v62 = vpop.permute.xlu0 %4697 }
 0x876   :  { %v8628_v24 = vpop.permute.xlu0 %4695 }
 0x880   :  { %4853 = vrot.lane.b32.xlu0 %v7996_v27, %s7623_s27 }
 0x8e2   :  { %v3915_v3 = vpop.xlane.xlu1 %3914 }
 0x8e3   :  { %v3937_v6 = vsub.f32 %v3363_v18, %v3915_v3 }
 0x8e5   :  { %v3945_v40 = vmul.f32 1.442695, %v3937_v6 }
 0x8e7   :  { %7513 = vpow2.f32 %v3945_v40  ;;  %v3918_v36 = vpop.xlane.xlu0 %3917 }
 0x8e8   :  { %v3938_v44 = vsub.f32 %v3441_v50, %v3918_v36 }
 0x8ea   :  { %v3947_v51 = vmul.f32 1.442695, %v3938_v44  ;;  %v3927_v2 = vpop.xlane.xlu1 %3926 }
 0x8eb   :  { %v3941_v61 = vsub.f32 %v3675_v54, %v3927_v2  ;;  %v3921_v22 = vpop.xlane.xlu0 %3920 }
 0x8ec   :  { %7515 = vpow2.f32 %v3947_v51  ;;  %v3939_v20 = vsub.f32 %v3519_v37, %v3921_v22 }
 0x8ed   :  { %v3953_v19 = vmul.f32 1.442695, %v3941_v61 }
 0x8ee   :  { %v3949_v8 = vmul.f32 1.442695, %v3939_v20  ;;  %v3933_v44 = vpop.xlane.xlu1 %3932 }
 0x8ef   :  { %v3924_v47 = vpop.xlane.xlu0 %3923  ;;  %v3943_v51 = vsub.f32 %v8594_v11, %v3933_v44 }
 0x8f0   :  { %7517 = vpow2.f32 %v3949_v8  ;;  %v3940_v55 = vsub.f32 %v3597_v9, %v3924_v47 }
 0x8f1   :  { %v7514_v1 = vpop.eup %7513  ;;  %7519 = vpow2.f32 %v3953_v19  ;;  %v3957_v61 = vmul.f32 1.442695, %v3943_v51 }
 0x8f2   :  { %v3951_v12 = vmul.f32 1.442695, %v3940_v55  ;;  %v3961_v18 = vsel %vm1199_vm8, %v7514_v1, 0.0  ;;  %v8673_v11 = vpop.permute.xlu1 %4773 }
 0x8f3   :  { %v3930_v3 = vpop.xlane.xlu0 %3929  ;;  %3962 = vadd.xlane.f32.xlu1 %v3961_v18 }
 0x8f4   :  { %7521 = vpow2.f32 %v3951_v12  ;;  %v3942_v50 = vsub.f32 %v3753_v58, %v3930_v3 }
 0x8f6   :  { %v7516_v6 = vpop.eup %7515  ;;  %v3955_v40 = vmul.f32 1.442695, %v3942_v50 }
 0x8f7   :  { %v3964_v54 = vsel %vm1199_vm8, %v7516_v6, 0.0  ;;  %v3936_v2 = vpop.xlane.xlu0 %3935 }
 0x8f8   :  { %7523 = vpow2.f32 %v3955_v40  ;;  %3965 = vadd.xlane.f32.xlu0 %v3964_v54  ;;  %v3944_v22 = vsub.f32 %v8599_v35, %v3936_v2 }
 0x8f9   :  { %7525 = vpow2.f32 %v3957_v61 }
 0x8fa   :  { %v7518_v37 = vpop.eup %7517  ;;  %v3959_v20 = vmul.f32 1.442695, %v3944_v22 }
 0x8fb   :  { %v3967_v36 = vsel %vm1199_vm8, %v7518_v37, 0.0  ;;  %v8633_v8 = vpop.eup %7519  ;;  %v8675_v35 = vpop.permute.xlu0 %4853 }
 0x8fc   :  { %3968 = vadd.xlane.f32.xlu1 %v3967_v36  ;;  %v3973_v55 = vsel %vm1199_vm8, %v8633_v8, 0.0  ;;  %7527 = vpow2.f32 %v3959_v20 }
 0x8fe   :  { %v8635_v47 = vpop.eup %7521 }
 0x8ff   :  { %v3970_v12 = vsel %vm1199_vm8, %v8635_v47, 0.0 }
 0x900   :  { %3974 = vadd.xlane.f32.xlu1 %v3973_v55  ;;  %3971 = vadd.xlane.f32.xlu0 %v3970_v12 }
 0x902   :  { %v8641_v9 = vpop.eup %7523 }
 0x903   :  { %v3976_v58 = vsel %vm1199_vm8, %v8641_v9, 0.0  ;;  %v8651_v19 = vpop.eup %7525 }
 0x904   :  { %3977 = vadd.xlane.f32.xlu0 %v3976_v58  ;;  %v3979_v18 = vsel %vm1199_vm8, %v8651_v19, 0.0 }
 0x906   :  { %v8655_v3 = vpop.eup %7527 }
 0x911   :  { %4931 = vrot.lane.b32.xlu1 %v8019_v31, %s7623_s27 }
 0x91a   :  { %4851 = vrot.lane.b32.xlu0 %v8211_v49, %s7624_s28  ;;  %v3982_v49 = vsel %vm1199_vm8, %v8655_v3, 0.0 }
 0x935   :  { %3980 = vadd.xlane.f32.xlu1 %v3979_v18 }
 0x939   :  { %3983 = vadd.xlane.f32.xlu0 %v3982_v49 }
 0x946   :  { %4929 = vrot.lane.b32.xlu1 %v8207_v48, %s7624_s28 }
 0x94a   :  { %5087 = vrot.lane.b32.xlu1 %v8031_v33, %s7623_s27 }
 0x94e   :  { %5085 = vrot.lane.b32.xlu1 %v8223_v46, %s7624_s28 }
 0x94f   :  { %5009 = vrot.lane.b32.xlu0 %v8008_v29, %s7623_s27 }
 0x953   :  { %5007 = vrot.lane.b32.xlu0 %v8227_v43, %s7624_s28 }
 0x957   :  { %5165 = vrot.lane.b32.xlu0 %v8023_v32, %s7623_s27 }
 0x95b   :  { %5163 = vrot.lane.b32.xlu0 %v8237_v53, %s7624_s28  ;;  %v9116_v53 = vmov 0.0  }
 0x980   :  { %v3963_v48 = vpop.xlane.xlu1 %3962 }
 0x981   :  { %7529 = vrcp.f32 %v3963_v48 }
 0x985   :  { %v3966_v50 = vpop.xlane.xlu0 %3965 }
 0x986   :  { %7531 = vrcp.f32 %v3966_v50 }
 0x989   :  { %v3969_v46 = vpop.xlane.xlu1 %3968 }
 0x98a   :  { %7533 = vrcp.f32 %v3969_v46 }
 0x98b   :  { %v7530_v40 = vpop.eup %7529 }
 0x98c   :  { %v3993_v54 = vmul.f32 %v7530_v40, %v7514_v1 }
 0x98d   :  { %v3975_v36 = vpop.xlane.xlu1 %3974  ;;  %v3972_v43 = vpop.xlane.xlu0 %3971 }
 0x98e   :  { %7535 = vrcp.f32 %v3975_v36  ;;  %7130 = vmatmul.mubr.msk.f32.vlgmr.msra.gmra.mrb[30].mxu0 %vm1290_vm9, %v3993_v54 }
 0x98f   :  { %7537 = vrcp.f32 %v3972_v43  ;;  %7138 = vmatpush3.msk.msra.mxu0 %vm274_vm3, %v8608_v0  ;;  %7139 = vmatprep.mubr.msk.f32.mxu0 %vm7615_vm6, %v9116_v53 }
 0x990   :  { %v7532_v55 = vpop.eup %7531  ;;  %7147 = vmatprep.subr.mxu0 %v9116_v53 }
 0x991   :  { %v3994_v12 = vmul.f32 %v7532_v55, %v7516_v6  ;;  %v3978_v58 = vpop.xlane.xlu0 %3977 }
 0x992   :  { %7539 = vrcp.f32 %v3978_v58 }
 0x993   :  { %7135 = vmatmul.mubr.msk.f32.vlgmr.msra.gmra.mrb[54].mxu1 %vm1290_vm9, %v3994_v12 }
 0x994   :  { %v7534_v1 = vpop.eup %7533  ;;  %7143 = vmatpush3.msk.msra.mxu1 %vm274_vm3, %v8610_v16  ;;  %7144 = vmatprep.mubr.msk.f32.mxu1 %vm7615_vm6, %v9116_v53 }
 0x995   :  { %v3995_v44 = vmul.f32 %v7534_v1, %v7518_v37  ;;  %7152 = vmatprep.subr.mxu1 %v9116_v53 }
 0x997   :  { %7140 = vmatmul.mubr.msk.f32.vlgmr.msra.gmra.mrb[32].mxu0 %vm1290_vm9, %v3995_v44 }
 0x998   :  { %v7536_v0 = vpop.eup %7535  ;;  %7148 = vmatpush3.msk.msra.mxu0 %vm274_vm3, %v8612_v28  ;;  %7149 = vmatprep.mubr.msk.f32.mxu0 %vm7615_vm6, %v9116_v53 }
 0x999   :  { %v7538_v6 = vpop.eup %7537  ;;  %v3997_v51 = vmul.f32 %v7536_v0, %v8633_v8  ;;  %7157 = vmatprep.subr.mxu0 %v9116_v53 }
 0x99a   :  { %v3996_v16 = vmul.f32 %v7538_v6, %v8635_v47 }
 0x99b   :  { %7150 = vmatmul.mubr.msk.f32.vlgmr.msra.gmra.mrb[34].mxu0 %vm1290_vm9, %v3997_v51 }
 0x99c   :  { %v7540_v37 = vpop.eup %7539  ;;  %7145 = vmatmul.mubr.msk.f32.vlgmr.msra.gmra.mrb[56].mxu1 %vm1290_vm9, %v3996_v16  ;;  %7158 = vmatpush3.msk.msra.mxu0 %vm274_vm3, %v8614_v38  ;;  %v4932_v38 = vpop.permute.xlu1 %4931 }
 0x99d   :  { %v3998_v28 = vmul.f32 %v7540_v37, %v8641_v9  ;;  %7153 = vmatpush3.msk.msra.mxu1 %vm274_vm3, %v8616_v13  ;;  %7154 = vmatprep.mubr.msk.f32.mxu1 %vm7615_vm6, %v9116_v53  ;;  %v4852_v13 = vpop.permute.xlu0 %4851 }
 0x99e   :  { %7162 = vmatprep.subr.mxu1 %v9116_v53  ;;  %7159 = vmatprep.mubr.msk.f32.mxu0 %vm7615_vm6, %v9116_v53 }
 0x99f   :  { %7167 = vmatprep.subr.mxu0 %v9116_v53 }
 0x9a0   :  { %7155 = vmatmul.mubr.msk.f32.vlgmr.msra.gmra.mrb[58].mxu1 %vm1290_vm9, %v3998_v28 }
 0x9a1   :  { %7163 = vmatpush3.msk.msra.mxu1 %vm274_vm3, %v8620_v41  ;;  %7164 = vmatprep.mubr.msk.f32.mxu1 %vm7615_vm6, %v9116_v53 }
 0x9a2   :  { %7172 = vmatprep.subr.mxu1 %v9116_v53 }
 0x9c2   :  { %v3981_v8 = vpop.xlane.xlu1 %3980 }
 0x9c3   :  { %7541 = vrcp.f32 %v3981_v8 }
 0x9c6   :  { %v3984_v47 = vpop.xlane.xlu0 %3983  ;;  %v4930_v20 = vpop.permute.xlu1 %4929 }
 0x9c7   :  { %7543 = vrcp.f32 %v3984_v47 }
 0x9ca   :  { %v5010_v22 = vpop.permute.xlu0 %5009 }
 0x9cd   :  { %v7542_v9 = vpop.eup %7541 }
 0x9ce   :  { %v3999_v2 = vmul.f32 %v7542_v9, %v8651_v19 }
 0x9d0   :  { %7160 = vmatmul.mubr.msk.f32.vlgmr.msra.gmra.mrb[36].mxu0 %vm1290_vm9, %v3999_v2 }
 0x9d1   :  { %v7544_v61 = vpop.eup %7543  ;;  %7168 = vmatpush3.xpose.msk.msra.mxu0 %vm535_vm7, %v8618_v17  ;;  %7169 = vmatprep.mubr.msk.f32.mxu0 %vm7615_vm6, %v9116_v53  ;;  %v5008_v17 = vpop.permute.xlu0 %5007 }
 0x9d2   :  { %v4000_v41 = vmul.f32 %v7544_v61, %v8655_v3  ;;  %7177 = vmatprep.subr.mxu0 %v9116_v53 }
 0x9d4   :  { %7165 = vmatmul.mubr.msk.f32.vlgmr.msra.gmra.mrb[60].mxu1 %vm1290_vm9, %v4000_v41  ;;  %7170 = vmatmul.mubr.msk.f32.vlgmr.msra.gmra.mrb[38].mxu0 %vm535_vm7, %v8622_v59  ;;  %v5088_v59 = vpop.permute.xlu1 %5087 }
 0x9d5   :  { %7173 = vmatpush3.xpose.msk.msra.mxu1 %vm535_vm7, %v8624_v62  ;;  %7178 = vmatpush3.xpose.msk.msra.mxu0 %vm535_vm7, %v8626_v63  ;;  %v5166_v62 = vpop.permute.xlu0 %5165 }
 0x9d6   :  { %7174 = vmatprep.mubr.msk.f32.mxu1 %vm7615_vm6, %v9116_v53  ;;  %7179 = vmatprep.mubr.msk.f32.mxu0 %vm7615_vm6, %v9116_v53 }
 0x9d7   :  { %7182 = vmatprep.subr.mxu1 %v9116_v53  ;;  %7187 = vmatprep.subr.mxu0 %v9116_v53 }
 0x9d8   :  { %7175 = vmatmul.mubr.msk.f32.vlgmr.msra.gmra.mrb[62].mxu1 %vm535_vm7, %v8628_v24  ;;  %7180 = vmatmul.mubr.msk.f32.vlgmr.msra.gmra.mrb[40].mxu0 %vm535_vm7, %v8673_v11  ;;  %v5086_v63 = vpop.permute.xlu1 %5085 }
 0x9d9   :  { %7183 = vmatpush3.xpose.msk.msra.mxu1 %vm535_vm7, %v8675_v35  ;;  %7188 = vmatpush3.xpose.msk.msra.mxu0 %vm535_vm7, %v4932_v38  ;;  %v5164_v24 = vpop.permute.xlu0 %5163 }
 0x9da   :  { %7184 = vmatprep.mubr.msk.f32.mxu1 %vm7615_vm6, %v9116_v53  ;;  %7189 = vmatprep.mubr.msk.f32.mxu0 %vm7615_vm6, %v9116_v53 }
 0x9db   :  { %7192 = vmatprep.subr.mxu1 %v9116_v53  ;;  %7197 = vmatprep.subr.mxu0 %v9116_v53 }
 0x9dc   :  { %7185 = vmatmul.mubr.msk.f32.vlgmr.msra.gmra.mrb[64].mxu1 %vm535_vm7, %v4852_v13  ;;  %7190 = vmatmul.mubr.msk.f32.vlgmr.msra.gmra.mrb[42].mxu0 %vm535_vm7, %v4930_v20 }
 0x9dd   :  { %7193 = vmatpush3.xpose.msk.msra.mxu1 %vm535_vm7, %v5010_v22  ;;  %7198 = vmatpush3.xpose.msk.msra.mxu0 %vm535_vm7, %v5088_v59 }
 0x9de   :  { %7194 = vmatprep.mubr.msk.f32.mxu1 %vm7615_vm6, %v9116_v53  ;;  %7199 = vmatprep.mubr.msk.f32.mxu0 %vm7615_vm6, %v9116_v53 }
 0x9df   :  { %7202 = vmatprep.subr.mxu1 %v9116_v53  ;;  %7207 = vmatprep.subr.mxu0 %v9116_v53 }
 0x9e0   :  { %7195 = vmatmul.mubr.msk.f32.vlgmr.msra.gmra.mrb[66].mxu1 %vm535_vm7, %v5008_v17  ;;  %7200 = vmatmul.mubr.msk.f32.vlgmr.msra.gmra.mrb[44].mxu0 %vm535_vm7, %v5086_v63 }
 0x9e1   :  { %7203 = vmatpush3.xpose.msk.msra.mxu1 %vm535_vm7, %v5166_v62  ;;  %7204 = vmatprep.mubr.msk.f32.mxu1 %vm7615_vm6, %v9116_v53 }
 0x9e2   :  { %7212 = vmatprep.subr.mxu1 %v9116_v53  ;;  %7209 = vmatprep.mubr.msk.f32.mxu0 %vm7615_vm6, %v9116_v53 }
 0x9e4   :  { %7205 = vmatmul.mubr.msk.f32.vlgmr.msra.gmra.mrb[68].mxu1 %vm535_vm7, %v5164_v24 }
 0x9e5   :  { %7214 = vmatprep.mubr.msk.f32.mxu1 %vm7615_vm6, %v9116_v53 }
 0xa61   :  { %v8771_v19 = vpop.f32.mrb[30].mxu0 }
 0xa62   :  { %v7131_v18 = vpop.f32.mrb[31].mxu0 }
 0xa66   :  { %v8773_v3 = vpop.f32.mrb[54].mxu1 }
 0xa67   :  { %v7136_v49 = vpop.f32.mrb[55].mxu1 }
 0xa6a   :  { %v8775_v11 = vpop.f32.mrb[32].mxu0 }
 0xa6b   :  { %v7141_v48 = vpop.f32.mrb[33].mxu0 }
 0xa6e   :  { %v8777_v35 = vpop.f32.mrb[34].mxu0 }
 0xa6f   :  { %v8779_v50 = vpop.f32.mrb[56].mxu1  ;;  %v7151_v46 = vpop.f32.mrb[35].mxu0 }
 0xa70   :  { %v7146_v40 = vpop.f32.mrb[57].mxu1 }
 0xa73   :  { %v8781_v54 = vpop.f32.mrb[58].mxu1 }
 0xa74   :  { %v7156_v36 = vpop.f32.mrb[59].mxu1 }
 0xaa3   :  { %v8783_v43 = vpop.f32.mrb[36].mxu0 }
 0xaa4   :  { %v7161_v55 = vpop.f32.mrb[37].mxu0 }
 0xaa7   :  { %v8785_v12 = vpop.f32.mrb[60].mxu1  ;;  %v4691_v58 = vpop.f32.mrb[38].mxu0 }
 0xaa8   :  { %v7166_v1 = vpop.f32.mrb[61].mxu1  ;;  %v7171_v44 = vpop.f32.mrb[39].mxu0  ;;  %v5241_v0 = vsel %vm1199_vm8, %v4691_v58, -inf }
 0xaa9   :  { %5242 = vmax.xlane.f32.xlu1 %v5241_v0 }
 0xaab   :  { %v4769_v6 = vpop.f32.mrb[62].mxu1  ;;  %v4847_v51 = vpop.f32.mrb[40].mxu0 }
 0xaac   :  { %v7176_v16 = vpop.f32.mrb[63].mxu1  ;;  %v7181_v37 = vpop.f32.mrb[41].mxu0  ;;  %v5244_v28 = vsel %vm1199_vm8, %v4769_v6, -inf  ;;  %v5247_v2 = vsel %vm1199_vm8, %v4847_v51, -inf }
 0xaad   :  { %5245 = vmax.xlane.f32.xlu0 %v5244_v28 }
 0xaaf   :  { %v4925_v38 = vpop.f32.mrb[64].mxu1  ;;  %v5003_v13 = vpop.f32.mrb[42].mxu0 }
 0xab0   :  { %v7186_v8 = vpop.f32.mrb[65].mxu1  ;;  %v7191_v47 = vpop.f32.mrb[43].mxu0  ;;  %v5253_v9 = vsel %vm1199_vm8, %v5003_v13, -inf  ;;  %v5250_v59 = vsel %vm1199_vm8, %v4925_v38, -inf }
 0xab1   :  { %5254 = vmax.xlane.f32.xlu1 %v5253_v9  ;;  %5248 = vmax.xlane.f32.xlu0 %v5247_v2 }
 0xab3   :  { %v5081_v61 = vpop.f32.mrb[66].mxu1  ;;  %v5159_v22 = vpop.f32.mrb[44].mxu0 }
 0xab4   :  { %v7196_v41 = vpop.f32.mrb[67].mxu1  ;;  %v7201_v20 = vpop.f32.mrb[45].mxu0  ;;  %v5259_v17 = vsel %vm1199_vm8, %v5159_v22, -inf  ;;  %v5256_v24 = vsel %vm1199_vm8, %v5081_v61, -inf }
 0xab5   :  { %5260 = vmax.xlane.f32.xlu1 %v5259_v17  ;;  %5251 = vmax.xlane.f32.xlu0 %v5250_v59 }
 0xab7   :  { %v5237_v62 = vpop.f32.mrb[68].mxu1 }
 0xab8   :  { %v7206_v63 = vpop.f32.mrb[69].mxu1  ;;  %v5262_v18 = vsel %vm1199_vm8, %v5237_v62, -inf }
 0xab9   :  { %5257 = vmax.xlane.f32.xlu0 %v5256_v24 }
 0xabd   :  { %5263 = vmax.xlane.f32.xlu0 %v5262_v18 }
 0xac6   :  { %5329 = vrot.lane.b32.xlu1 %v7981_v23, %s7625_s29 }
 0xaca   :  { %5483 = vrot.lane.b32.xlu1 %v8011_v30, %s7625_s29 }
 0xace   :  { %5560 = vrot.lane.b32.xlu1 %v7996_v27, %s7625_s29 }
 0xad2   :  { %5637 = vrot.lane.b32.xlu1 %v8019_v31, %s7625_s29 }
 0xad3   :  { %5406 = vrot.lane.b32.xlu0 %v7993_v26, %s7625_s29 }
 0xad7   :  { %5714 = vrot.lane.b32.xlu0 %v8008_v29, %s7625_s29 }
 0xb36   :  { %v5243_v49 = vpop.xlane.xlu1 %5242 }
 0xb37   :  { %v5265_v48 = vsub.f32 %v4691_v58, %v5243_v49 }
 0xb39   :  { %v5273_v46 = vmul.f32 1.442695, %v5265_v48 }
 0xb3a   :  { %v5246_v40 = vpop.xlane.xlu0 %5245 }
 0xb3b   :  { %7545 = vpow2.f32 %v5273_v46  ;;  %v5266_v23 = vsub.f32 %v4769_v6, %v5246_v40 }
 0xb3d   :  { %v5275_v36 = vmul.f32 1.442695, %v5266_v23 }
 0xb3e   :  { %v5255_v30 = vpop.xlane.xlu1 %5254  ;;  %v5249_v55 = vpop.xlane.xlu0 %5248 }
 0xb3f   :  { %7547 = vpow2.f32 %v5275_v36  ;;  %v5269_v27 = vsub.f32 %v5003_v13, %v5255_v30  ;;  %v5267_v1 = vsub.f32 %v4847_v51, %v5249_v55 }
 0xb41   :  { %v5277_v44 = vmul.f32 1.442695, %v5267_v1  ;;  %v5281_v31 = vmul.f32 1.442695, %v5269_v27 }
 0xb42   :  { %v5261_v0 = vpop.xlane.xlu1 %5260  ;;  %v5252_v16 = vpop.xlane.xlu0 %5251 }
 0xb43   :  { %v5271_v26 = vsub.f32 %v5159_v22, %v5261_v0  ;;  %v5268_v37 = vsub.f32 %v4925_v38, %v5252_v16  ;;  %7549 = vpow2.f32 %v5277_v44 }
 0xb44   :  { %7551 = vpow2.f32 %v5281_v31 }
 0xb45   :  { %v8807_v29 = vpop.eup %7545  ;;  %v5279_v58 = vmul.f32 1.442695, %v5268_v37  ;;  %v5285_v28 = vmul.f32 1.442695, %v5271_v26 }
 0xb46   :  { %v5330_v8 = vpop.permute.xlu1 %5329  ;;  %v5258_v6 = vpop.xlane.xlu0 %5257  ;;  %v5289_v47 = vsel %vm1199_vm8, %v8807_v29, 0.0 }
 0xb47   :  { %v5270_v9 = vsub.f32 %v5081_v61, %v5258_v6  ;;  %5290 = vadd.xlane.f32.xlu1 %v5289_v47  ;;  %7208 = vmatpush3.msk.msra.mxu0 %vm274_vm3, %v5330_v8  ;;  %7553 = vpow2.f32 %v5279_v58  ;;  %v6067_v58 = vld [vmem:[%s9093_s11] sm:$0xff] }
 0xb48   :  { %7217 = vmatprep.subr.mxu0 %v9116_v53  ;;  %7555 = vpow2.f32 %v5285_v28  ;;  %v6068_v28 = vld [vmem:[%s9093_s11 + $0x8] sm:$0xff] }
 0xb49   :  { %v8813_v51 = vpop.eup %7547  ;;  %v5283_v38 = vmul.f32 1.442695, %v5270_v9  ;;  %v7372_v8 = vpack.c.bf16 %v6068_v28, %v6067_v58  ;;  %v9117_v28 = vld [vmem:[#allocation6_spill] sm:$0xff] }
 0xb4a   :  { %v5264_v13 = vpop.xlane.xlu0 %5263  ;;  %v5292_v2 = vsel %vm1199_vm8, %v8813_v51, 0.0 }
 0xb4b   :  { %7557 = vpow2.f32 %v5283_v38  ;;  %v5272_v22 = vsub.f32 %v5237_v62, %v5264_v13  ;;  %5293 = vadd.xlane.f32.xlu0 %v5292_v2  ;;  %v6070_v38 = vld [vmem:[%s9093_s11 + $0x18] sm:$0xff] }
 0xb4d   :  { %v5287_v41 = vmul.f32 1.442695, %v5272_v22  ;;  %v8817_v20 = vpop.eup %7549 }
 0xb4e   :  { %v5407_v61 = vpop.permute.xlu0 %5406  ;;  %v5295_v17 = vsel %vm1199_vm8, %v8817_v20, 0.0  ;;  %v8822_v59 = vpop.eup %7551 }
 0xb4f   :  { %7559 = vpow2.f32 %v5287_v41  ;;  %7213 = vmatpush3.msk.msra.mxu1 %vm274_vm3, %v5407_v61  ;;  %5296 = vadd.xlane.f32.xlu1 %v5295_v17  ;;  %v5301_v62 = vsel %vm1199_vm8, %v8822_v59, 0.0 }
 0xb50   :  { %7222 = vmatprep.subr.mxu1 %v9116_v53 }
 0xb51   :  { %v8825_v63 = vpop.eup %7553 }
 0xb52   :  { %v5298_v24 = vsel %vm1199_vm8, %v8825_v63, 0.0  ;;  %v8831_v18 = vpop.eup %7555 }
 0xb53   :  { %5302 = vadd.xlane.f32.xlu1 %v5301_v62  ;;  %5299 = vadd.xlane.f32.xlu0 %v5298_v24  ;;  %v5307_v46 = vsel %vm1199_vm8, %v8831_v18, 0.0 }
 0xb55   :  { %v8833_v49 = vpop.eup %7557 }
 0xb56   :  { %v5304_v48 = vsel %vm1199_vm8, %v8833_v49, 0.0 }
 0xb57   :  { %5308 = vadd.xlane.f32.xlu1 %v5307_v46  ;;  %5305 = vadd.xlane.f32.xlu0 %v5304_v48 }
 0xb59   :  { %v8839_v40 = vpop.eup %7559 }
 0xb5a   :  { %v5310_v23 = vsel %vm1199_vm8, %v8839_v40, 0.0 }
 0xb5b   :  { %5311 = vadd.xlane.f32.xlu0 %v5310_v23 }
 0xb68   :  { %5791 = vrot.lane.b32.xlu1 %v8031_v33, %s7625_s29 }
 0xb6c   :  { %5953 = vrot.lane.b32.xlu1 %v8574_v7, %s7626_s0 }
 0xb70   :  { %5957 = vrot.lane.b32.xlu1 %v8578_v10, %s7626_s0 }
 0xb71   :  { %5868 = vrot.lane.b32.xlu0 %v8023_v32, %s7625_s29  ;;  %v5484_v32 = vpop.permute.xlu1 %5483 }
 0xb74   :  { %5961 = vrot.lane.b32.xlu1 %v8580_v15, %s7626_s0 }
 0xb75   :  { %5955 = vrot.lane.b32.xlu0 %v8576_v34, %s7626_s0  ;;  %v5561_v33 = vpop.permute.xlu1 %5560  ;;  %v5715_v34 = vpop.permute.xlu0 %5714 }
 0xb78   :  { %5965 = vrot.lane.b32.xlu1 %v8584_v4, %s7626_s0 }
 0xb79   :  { %5959 = vrot.lane.b32.xlu0 %v8582_v60, %s7626_s0  ;;  %v5638_v7 = vpop.permute.xlu1 %5637 }
 0xb7c   :  { %5985 = vrot.lane.b32.xlu1 %v8771_v19, %s7627_s30 }
 0xb7d   :  { %5963 = vrot.lane.b32.xlu0 %v8586_v21, %s7626_s0 }
 0xb80   :  { %5989 = vrot.lane.b32.xlu1 %v8775_v11, %s7627_s30 }
 0xb81   :  { %5967 = vrot.lane.b32.xlu0 %v8588_v25, %s7626_s0 }
 0xb84   :  { %5993 = vrot.lane.b32.xlu1 %v8777_v35, %s7627_s30 }
 0xb85   :  { %5987 = vrot.lane.b32.xlu0 %v8773_v3, %s7627_s30 }
 0xb88   :  { %5997 = vrot.lane.b32.xlu1 %v8783_v43, %s7627_s30 }
 0xb89   :  { %5991 = vrot.lane.b32.xlu0 %v8779_v50, %s7627_s30 }
 0xb8d   :  { %5995 = vrot.lane.b32.xlu0 %v8781_v54, %s7627_s30 }
 0xb91   :  { %5999 = vrot.lane.b32.xlu0 %v8785_v12, %s7627_s30 }
 0xbd4   :  { %v5291_v10 = vpop.xlane.xlu1 %5290 }
 0xbd5   :  { %7561 = vrcp.f32 %v5291_v10 }
 0xbd8   :  { %v5294_v15 = vpop.xlane.xlu0 %5293 }
 0xbd9   :  { %7563 = vrcp.f32 %v5294_v15 }
 0xbdc   :  { %v5297_v60 = vpop.xlane.xlu1 %5296 }
 0xbdd   :  { %7565 = vrcp.f32 %v5297_v60 }
 0xbdf   :  { %v7562_v4 = vpop.eup %7561 }
 0xbe0   :  { %v5321_v21 = vmul.f32 %v7562_v4, %v8807_v29  ;;  %v5303_v25 = vpop.xlane.xlu1 %5302  ;;  %v5300_v19 = vpop.xlane.xlu0 %5299 }
 0xbe1   :  { %7567 = vrcp.f32 %v5303_v25 }
 0xbe2   :  { %7210 = vmatmul.mubr.msk.f32.vlgmr.msra.gmra.mrb[46].mxu0 %vm1290_vm9, %v5321_v21  ;;  %7569 = vrcp.f32 %v5300_v19 }
 0xbe3   :  { %v7564_v3 = vpop.eup %7563  ;;  %7218 = vmatpush3.msk.msra.mxu0 %vm274_vm3, %v5484_v32  ;;  %7219 = vmatprep.mubr.msk.f32.mxu0 %vm7615_vm6, %v9116_v53 }
 0xbe4   :  { %v5322_v11 = vmul.f32 %v7564_v3, %v8813_v51  ;;  %7227 = vmatprep.subr.mxu0 %v9116_v53  ;;  %v5309_v35 = vpop.xlane.xlu1 %5308  ;;  %v5306_v50 = vpop.xlane.xlu0 %5305  ;;  %v6069_v51 = vld [vmem:[%s9093_s11 + $0x10] sm:$0xff] }
 0xbe5   :  { %7571 = vrcp.f32 %v5309_v35  ;;  %v7378_v13 = vpack.c.bf16 %v6070_v38, %v6069_v51 }
 0xbe6   :  { %7215 = vmatmul.mubr.msk.f32.vlgmr.msra.gmra.mrb[70].mxu1 %vm1290_vm9, %v5322_v11  ;;  %7573 = vrcp.f32 %v5306_v50 }
 0xbe7   :  { %7223 = vmatpush3.msk.msra.mxu1 %vm274_vm3, %v5561_v33  ;;  %7224 = vmatprep.mubr.msk.f32.mxu1 %vm7615_vm6, %v9116_v53  ;;  %v7566_v54 = vpop.eup %7565 }
 0xbe8   :  { %7232 = vmatprep.subr.mxu1 %v9116_v53  ;;  %v5323_v43 = vmul.f32 %v7566_v54, %v8817_v20  ;;  %v5312_v12 = vpop.xlane.xlu0 %5311  ;;  %v5792_v1 = vpop.permute.xlu1 %5791 }
 0xbe9   :  { %7575 = vrcp.f32 %v5312_v12 }
 0xbea   :  { %7220 = vmatmul.mubr.msk.f32.vlgmr.msra.gmra.mrb[48].mxu0 %vm1290_vm9, %v5323_v43 }
 0xbeb   :  { %v7568_v36 = vpop.eup %7567  ;;  %7228 = vmatpush3.msk.msra.mxu0 %vm274_vm3, %v5638_v7  ;;  %7229 = vmatprep.mubr.msk.f32.mxu0 %vm7615_vm6, %v9116_v53 }
 0xbec   :  { %v7570_v30 = vpop.eup %7569  ;;  %v5325_v55 = vmul.f32 %v7568_v36, %v8822_v59  ;;  %7237 = vmatprep.subr.mxu0 %v9116_v53  ;;  %v5869_v37 = vpop.permute.xlu0 %5868 }
 0xbed   :  { %v5324_v27 = vmul.f32 %v7570_v30, %v8825_v63  ;;  %v5954_v48 = vpop.permute.xlu1 %5953 }
 0xbee   :  { %7230 = vmatmul.mubr.msk.f32.vlgmr.msra.gmra.mrb[50].mxu0 %vm1290_vm9, %v5325_v55  ;;  %v6041_v35 = vsel %vm535_vm7, %v8340_v14, %v5954_v48 }
 0xbef   :  { %v7572_v44 = vpop.eup %7571  ;;  %7225 = vmatmul.mubr.msk.f32.vlgmr.msra.gmra.mrb[72].mxu1 %vm1290_vm9, %v5324_v27  ;;  %7238 = vmatpush3.msk.msra.mxu0 %vm274_vm3, %v5792_v1 }
 0xbf0   :  { %v7574_v31 = vpop.eup %7573  ;;  %v5327_v0 = vmul.f32 %v7572_v44, %v8831_v18  ;;  %7233 = vmatpush3.msk.msra.mxu1 %vm274_vm3, %v5715_v34  ;;  %7234 = vmatprep.mubr.msk.f32.mxu1 %vm7615_vm6, %v9116_v53  ;;  %v5956_v46 = vpop.permute.xlu0 %5955 }
 0xbf1   :  { %v5326_v16 = vmul.f32 %v7574_v31, %v8833_v49  ;;  %7239 = vmatprep.mubr.msk.f32.mxu0 %vm7615_vm6, %v9116_v53  ;;  %7242 = vmatprep.subr.mxu1 %v9116_v53  ;;  %v6042_v50 = vsel %vm535_vm7, %v8342_v39, %v5956_v46 }
 0xbf2   :  { %7240 = vmatmul.mubr.msk.f32.vlgmr.msra.gmra.mrb[52].mxu0 %vm1290_vm9, %v5327_v0  ;;  %7374 = vmatprep.subr.msk.bf16.mxu0 %vm7738_vm1, %v7372_v8 }
 0xbf3   :  { %v7576_v26 = vpop.eup %7575  ;;  %7235 = vmatmul.mubr.msk.f32.vlgmr.msra.gmra.mrb[74].mxu1 %vm1290_vm9, %v5326_v16 }
 0xbf4   :  { %v5328_v29 = vmul.f32 %v7576_v26, %v8839_v40  ;;  %7243 = vmatpush3.msk.msra.mxu1 %vm274_vm3, %v5869_v37  ;;  %7244 = vmatprep.mubr.msk.f32.mxu1 %vm7615_vm6, %v9116_v53  ;;  %v5958_v40 = vpop.permute.xlu1 %5957  ;;  %v5960_v23 = vpop.permute.xlu0 %5959 }
 0xbf5   :  { %v6043_v1 = vsel %vm535_vm7, %v8344_v42, %v5958_v40  ;;  %v6044_v14 = vsel %vm535_vm7, %v8346_v52, %v5960_v23 }
 0xbf6   :  { %7377 = vmatpush3.bf16.xpose.msk.msra.mxu0 %vm7738_vm1, %v7372_v8 }
 0xbf7   :  { %7245 = vmatmul.mubr.msk.f32.vlgmr.msra.gmra.mrb[76].mxu1 %vm1290_vm9, %v5328_v29  ;;  %7380 = vmatprep.subr.msk.bf16.mxu0 %vm7738_vm1, %v7378_v13 }
 0xbf8   :  { %v5962_v32 = vpop.permute.xlu1 %5961  ;;  %v5964_v33 = vpop.permute.xlu0 %5963 }
 0xbf9   :  { %v6045_v29 = vsel %vm535_vm7, %v8348_v57, %v5962_v32  ;;  %v6046_v42 = vsel %vm535_vm7, %v8350_v56, %v5964_v33  ;;  %v9118_v57 = vld [vmem:[#allocation7_spill] sm:$0xff]  ;;  %v9119_v56 = vld [vmem:[#allocation8_spill] sm:$0xff] }
 0xbfc   :  { %v5966_v7 = vpop.permute.xlu1 %5965  ;;  %v5968_v34 = vpop.permute.xlu0 %5967 }
 0xbfe   :  { %7383 = vmatpush3.bf16.xpose.msk.msra.mxu0 %vm7738_vm1, %v7378_v13 }
 0xc00   :  { %v5986_v10 = vpop.permute.xlu1 %5985  ;;  %v5988_v15 = vpop.permute.xlu0 %5987 }
 0xc01   :  { %v6050_v54 = vsel %vm6049_vm10, %v6041_v35, %v5986_v10  ;;  %v6051_v43 = vsel %vm6049_vm10, %v6042_v50, %v5988_v15  ;;  %v7586_v15 = vld [vmem:[%s9084_s2] sm:$0xff] }
 0xc04   :  { %v5990_v60 = vpop.permute.xlu1 %5989  ;;  %v5992_v4 = vpop.permute.xlu0 %5991 }
 0xc05   :  { %v6052_v44 = vsel %vm6049_vm10, %v6043_v1, %v5990_v60  ;;  %v6053_v39 = vsel %vm6049_vm10, %v6044_v14, %v5992_v4  ;;  %v6271_v14 = vld [vmem:[%s9095_s13 + $0x10] sm:$0xff] }
 0xc08   :  { %v5994_v21 = vpop.permute.xlu1 %5993  ;;  %v5996_v25 = vpop.permute.xlu0 %5995 }
 0xc09   :  { %v6054_v58 = vsel %vm6049_vm10, %v6045_v29, %v5994_v21  ;;  %v6055_v52 = vsel %vm6049_vm10, %v6046_v42, %v5996_v25  ;;  %v9120_v25 = vld [vmem:[#allocation5_spill] sm:$0xff] }
 0xc0c   :  { %v5998_v19 = vpop.permute.xlu1 %5997  ;;  %v6000_v3 = vpop.permute.xlu0 %5999 }
 0xcb5   :  { %v5402_v6 = vpop.f32.mrb[46].mxu0 }
 0xcb6   :  { %v7211_v47 = vpop.f32.mrb[47].mxu0  ;;  %6017 = vrot.lane.b32.xlu1 %v5402_v6, %s7628_s20 }
 0xcb9   :  { %v5479_v53 = vpop.f32.mrb[70].mxu1 }
 0xcba   :  { %6019 = vrot.lane.b32.xlu0 %v5479_v53, %s7628_s20  ;;  %v7216_v9 = vpop.f32.mrb[71].mxu1 }
 0xcbd   :  { %v5556_v2 = vpop.f32.mrb[48].mxu0 }
 0xcbe   :  { %6021 = vrot.lane.b32.xlu1 %v5556_v2, %s7628_s20  ;;  %v7221_v22 = vpop.f32.mrb[49].mxu0  ;;  %v6047_v2 = vsel %vm535_vm7, %v9118_v57, %v5966_v7 }
 0xcbf   :  { %v6048_v22 = vsel %vm535_vm7, %v9119_v56, %v5968_v34  ;;  %v7585_v34 = vld [vmem:[%s9084_s2 + $0x8] sm:$0xff] }
 0xcc1   :  { %v5710_v41 = vpop.f32.mrb[50].mxu0 }
 0xcc2   :  { %v5633_v20 = vpop.f32.mrb[72].mxu1  ;;  %6025 = vrot.lane.b32.xlu1 %v5710_v41, %s7628_s20  ;;  %v7231_v61 = vpop.f32.mrb[51].mxu0  ;;  %v6056_v41 = vsel %vm6049_vm10, %v6047_v2, %v5998_v19  ;;  %v6269_v19 = vld [vmem:[%s9095_s13] sm:$0xff] }
 0xcc3   :  { %6023 = vrot.lane.b32.xlu0 %v5633_v20, %s7628_s20  ;;  %v7226_v17 = vpop.f32.mrb[73].mxu1  ;;  %v6057_v20 = vsel %vm6049_vm10, %v6048_v22, %v6000_v3  ;;  %v6270_v3 = vld [vmem:[%s9095_s13 + $0x8] sm:$0xff] }
 0xcc5   :  { %v5864_v59 = vpop.f32.mrb[52].mxu0 }
 0xcc6   :  { %v5787_v63 = vpop.f32.mrb[74].mxu1  ;;  %6029 = vrot.lane.b32.xlu1 %v5864_v59, %s7628_s20  ;;  %v7241_v62 = vpop.f32.mrb[53].mxu0 }
 0xcc7   :  { %6027 = vrot.lane.b32.xlu0 %v5787_v63, %s7628_s20  ;;  %v7236_v24 = vpop.f32.mrb[75].mxu1 }
 0xcca   :  { %v5941_v18 = vpop.f32.mrb[76].mxu1  ;;  %6211 = vrot.lane.b32.xlu1 %v7947_v45, %s7616_s10 }
 0xccb   :  { %6031 = vrot.lane.b32.xlu0 %v5941_v18, %s7628_s20  ;;  %v7246_v49 = vpop.f32.mrb[77].mxu1  ;;  %s7629_s20 = smov 32  }
 0xccc   :  { %v6709_v49 = vld [vmem:[%s9094_s12] ss:$0 sm:$0xff] }
 0xd28   :  { %v6018_v11 = vpop.permute.xlu1 %6017 }
 0xd29   :  { %v6059_v36 = vsel %vm6058_vm11, %v6050_v54, %v6018_v11  ;;  %v7384_v11 = vpack.c.bf16 %v6270_v3, %v6269_v19 }
 0xd2b   :  { %7386 = vmatprep.subr.msk.bf16.mxu1 %vm7738_vm1, %v7384_v11 }
 0xd2c   :  { %v6020_v12 = vpop.permute.xlu0 %6019  ;;  %7389 = vmatpush3.bf16.xpose.msk.msra.mxu1 %vm7738_vm1, %v7384_v11 }
 0xd2d   :  { %v6060_v30 = vsel %vm6058_vm11, %v6051_v43, %v6020_v12 }
 0xd2e   :  { %v6086_v55 = vcombine.low %v6059_v36, %v6060_v30 }
 0xd30   :  { %v6022_v27 = vpop.permute.xlu1 %6021  ;;  %v6094_v8 = vrot.slane %v6086_v55, %v9117_v28 }
 0xd31   :  { %v6061_v16 = vsel %vm6058_vm11, %v6052_v44, %v6022_v27  ;;  %v6272_v44 = vld [vmem:[%s9095_s13 + $0x18] sm:$0xff] }
 0xd34   :  { %v6026_v31 = vpop.permute.xlu1 %6025 }
 0xd35   :  { %v6024_v0 = vpop.permute.xlu0 %6023  ;;  %v6063_v53 = vsel %vm6058_vm11, %v6054_v58, %v6026_v31  ;;  %v6273_v31 = vld [vmem:[%s9095_s13 + $0x20] sm:$0xff] }
 0xd36   :  { %v6062_v26 = vsel %vm6058_vm11, %v6053_v39, %v6024_v0  ;;  %v7390_v39 = vpack.c.bf16 %v6272_v44, %v6271_v14  ;;  %v6274_v0 = vld [vmem:[%s9095_s13 + $0x28] sm:$0xff] }
 0xd37   :  { %v6087_v37 = vcombine.low %v6061_v16, %v6062_v26  ;;  %v7396_v16 = vpack.c.bf16 %v6274_v0, %v6273_v31  ;;  %v6275_v26 = vld [vmem:[%s9095_s13 + $0x30] sm:$0xff] }
 0xd38   :  { %v6030_v38 = vpop.permute.xlu1 %6029  ;;  %7392 = vmatprep.subr.msk.bf16.mxu1 %vm7738_vm1, %v7390_v39 }
 0xd39   :  { %v6101_v6 = vrot.slane %v6087_v37, %v9117_v28  ;;  %v6028_v47 = vpop.permute.xlu0 %6027  ;;  %v6065_v17 = vsel %vm6058_vm11, %v6056_v41, %v6030_v38  ;;  %7395 = vmatpush3.bf16.xpose.msk.msra.mxu1 %vm7738_vm1, %v7390_v39  ;;  %v6276_v37 = vld [vmem:[%s9095_s13 + $0x38] sm:$0xff] }
 0xd3a   :  { %v6064_v9 = vsel %vm6058_vm11, %v6055_v52, %v6028_v47  ;;  %7398 = vmatprep.subr.msk.bf16.mxu1 %vm7738_vm1, %v7396_v16  ;;  %v7402_v29 = vpack.c.bf16 %v6276_v37, %v6275_v26  ;;  %v6716_v47 = vld [vmem:[%s9089_s7] ss:$0 sm:$0xff] }
 0xd3b   :  { %v6102_v51 = vcombine.low %v6094_v8, %v6101_v6  ;;  %v6103_v13 = vcombine.low %v6063_v53, %v6064_v9  ;;  %v6717_v9 = vld [vmem:[%s9090_s8] ss:$0 sm:$0xff] }
 0xd3c   :  { %v6212_v23 = vpop.permute.xlu1 %6211 }
 0xd3d   :  { %7255 = vmatprep.mubr.msk.f32.mxu0 %vm113_vm0, %v6102_v51  ;;  %v6032_v61 = vpop.permute.xlu0 %6031  ;;  %v6111_v62 = vrot.slane %v6103_v13, %v9117_v28 }
 0xd3e   :  { %v6066_v59 = vsel %vm6058_vm11, %v6057_v20, %v6032_v61 }
 0xd3f   :  { %v6104_v63 = vcombine.low %v6065_v17, %v6066_v59  ;;  %v6407_v17 = vld [vmem:[%s9097_s15] sm:$0xff]  ;;  %v6408_v59 = vld [vmem:[%s9097_s15 + $0x8] sm:$0xff] }
 0xd41   :  { %v6118_v24 = vrot.slane %v6104_v63, %v9117_v28  ;;  %7401 = vmatpush3.bf16.xpose.msk.msra.mxu1 %vm7738_vm1, %v7396_v16  ;;  %v7408_v63 = vpack.c.bf16 %v6408_v59, %v6407_v17 }
 0xd42   :  { %7404 = vmatprep.subr.msk.bf16.mxu1 %vm7738_vm1, %v7402_v29 }
 0xd43   :  { %v6119_v18 = vcombine.low %v6111_v62, %v6118_v24  ;;  %v6409_v62 = vld [vmem:[%s9097_s15 + $0x10] sm:$0xff]  ;;  %v6410_v24 = vld [vmem:[%s9097_s15 + $0x18] sm:$0xff]  ;;  %7410 = vmatprep.subr.msk.bf16.mxu0 %vm7409_vm13, %v7408_v63 }
 0xd45   :  { %7256 = vmatmul.mubr.msk.f32.vlgmr.msra.gmra.mrb[54].mxu0 %vm113_vm0, %v6119_v18  ;;  %v7414_v18 = vpack.c.bf16 %v6410_v24, %v6409_v62 }
 0xd46   :  { %7413 = vmatpush3.bf16.xpose.msk.msra.mxu0 %vm7409_vm13, %v7408_v63 }
 0xd47   :  { %7416 = vmatprep.subr.msk.bf16.mxu0 %vm7409_vm13, %v7414_v18 }
 0xd49   :  { %7407 = vmatpush3.bf16.xpose.msk.msra.mxu1 %vm7738_vm1, %v7402_v29 }
 0xd4e   :  { %7419 = vmatpush3.bf16.xpose.msk.msra.mxu0 %vm7409_vm13, %v7414_v18 }
 0xe18   :  { %v7257_v48 = vpop.f32.mrb[54].mxu0 }
 0xe19   :  { %v6208_v46 = vadd.f32 %v7257_v48, %v6709_v49  ;;  %v6202_v40 = vpop.f32.mrb[55].mxu0 }
 0xe1a   :  { %v6203_v32 = vadd.f32 %v6709_v49, %v6202_v40  ;;  %v6718_v49 = vld [vmem:[%s9096_s14] ss:$0 sm:$0xff] }
 0xe1b   :  { %v6215_v33 = vmul.f32 %v6212_v23, %v6208_v46 }
 0xe1c   :  { %v6214_v7 = vmul.f32 %v6212_v23, %v6203_v32 }
 0xe1d   :  { %v8975_v10 = vadd.f32 %v7585_v34, %v6215_v33 }
 0xe1e   :  { %v8980_v60 = vadd.f32 %v7586_v15, %v6214_v7 }
 0xe1f   :  { %v6221_v4 = vsel %vm113_vm0, %v8975_v10, 0.0 }
 0xe20   :  { %6222 = vadd.xlane.f32.xlu1 %v6221_v4  ;;  %v6218_v21 = vsel %vm113_vm0, %v8980_v60, 0.0 }
 0xe21   :  { %6219 = vadd.xlane.f32.xlu0 %v6218_v21 }
 0xe31   :  { %6513 = vrot.lane.b32.xlu1 %v9120_v25, %s7613_s9  ;;  %s7630_s9 = smov [#allocation2]  }
 0xe32   :  { %s6527_s29 = sshll.u32 %s7630_s9, 4  ;;  %s6528_s29 = int_to_ptr.vmem [resolvable:$true] %s6527_s29 }
 0xe33   :  { %s7587_s30 = scalar_lea.vmem %s6528_s29, 256  ;;  %p7592_p1 = scmp.lt.s32.totalorder %s6528_s29, %s6528_s29 }
 0xe34   :  { %p7588_p0 = scmp.ne.s32.totalorder %s6528_s29, %s7587_s30  ;;  %p7593_p2 = scmp.lt.s32.totalorder %s7587_s30, %s7587_s30 }
 0xe36   :  { %p7594_p3 = por %p7593_p2, %p7592_p1 }
 0xe38   :  { %p7595_p4 = pnand %p7594_p3, %p7588_p0 }
 0xead   :  { %v6223_v35 = vpop.xlane.xlu1 %6222 }
 0xeae   :  { %v6225_v50 = vmul.f32 0.03125, %v6223_v35  ;;  %v6220_v54 = vpop.xlane.xlu0 %6219 }
 0xeaf   :  { %v6224_v43 = vmul.f32 0.03125, %v6220_v54 }
 0xeb0   :  { %v6227_v12 = vsub.f32 %v8975_v10, %v6225_v50 }
 0xeb1   :  { %v6226_v36 = vsub.f32 %v8980_v60, %v6224_v43  ;;  %v6514_v44 = vpop.permute.xlu1 %6513 }
 0xeb2   :  { %v6229_v27 = vmul.f32 %v6227_v12, %v6227_v12 }
 0xeb3   :  { %v6228_v30 = vmul.f32 %v6226_v36, %v6226_v36 }
 0xeb4   :  { %v6233_v1 = vsel %vm113_vm0, %v6229_v27, 0.0 }
 0xeb5   :  { %v6230_v55 = vsel %vm113_vm0, %v6228_v30, 0.0 }
 0xeb6   :  { %6231 = vadd.xlane.f32.xlu0 %v6230_v55  ;;  %v6729_v55 = vld [vmem:[%s9098_s16] ss:$0 sm:$0xff] }
 0xeba   :  { %6234 = vadd.xlane.f32.xlu0 %v6233_v1 }
 0xed0   :  { %6262 = vrot.lane.b32.xlu0 %v7947_v45, %s7629_s20 }
 0xf43   :  { %v6232_v45 = vpop.xlane.xlu0 %6231 }
 0xf44   :  { %v6236_v42 = vmul.f32 0.03125, %v6232_v45 }
 0xf46   :  { %v6238_v58 = vadd.f32 1e-05, %v6236_v42 }
 0xf47   :  { %v6235_v52 = vpop.xlane.xlu0 %6234 }
 0xf48   :  { %7577 = vrsqrt.f32 %v6238_v58  ;;  %v6237_v28 = vmul.f32 0.03125, %v6235_v52 }
 0xf4a   :  { %v6239_v8 = vadd.f32 1e-05, %v6237_v28 }
 0xf4b   :  { %v6263_v57 = vpop.permute.xlu0 %6262 }
 0xf4c   :  { %7579 = vrsqrt.f32 %v6239_v8 }
 0xf52   :  { %v7578_v6 = vpop.eup %7577 }
 0xf53   :  { %v6242_v53 = vmul.f32 %v7578_v6, %v6226_v36 }
 0xf55   :  { %v6251_v5 = vmul.f32 %v6716_v47, %v6242_v53 }
 0xf56   :  { %v7580_v51 = vpop.eup %7579 }
 0xf57   :  { %v6243_v38 = vmul.f32 %v7580_v51, %v6227_v12  ;;  %v6260_v13 = vadd.f32 %v6717_v9, %v6251_v5 }
 0xf59   :  { %v6252_v2 = vmul.f32 %v6716_v47, %v6243_v38  ;;  %v6265_v56 = vmul.f32 %v6263_v57, %v6260_v13 }
 0xf5b   :  { %v6261_v22 = vadd.f32 %v6717_v9, %v6252_v2  ;;  %v6267_v41 = vadd.f32 %v6265_v56, %v9120_v25 }
 0xf5d   :  { %v6266_v20 = vmul.f32 %v6263_v57, %v6261_v22  ;;  %7274 = vmatprep.mubr.msk.f32.mxu1 %vm113_vm0, %v6267_v41 }
 0xf5f   :  { %v6268_v61 = vadd.f32 %v6266_v20, %v9120_v25 }
 0xf61   :  { %7275 = vmatmul.mubr.msk.f32.vlgmr.msra.gmra.mrb[78].mxu1 %vm113_vm0, %v6268_v61 }
0x1034   :  { %v7276_v48 = vpop.f32.mrb[78].mxu1 }
0x1035   :  { %v6386_v46 = vadd.f32 %v7276_v48, %v6718_v49  ;;  %v6380_v40 = vpop.f32.mrb[79].mxu1 }
0x1036   :  { %v6381_v23 = vadd.f32 %v6718_v49, %v6380_v40 }
0x1037   :  { %v6392_v32 = vmul.f32 0.044715, %v6386_v46  ;;  %v6390_v12 = vmul.f32 0.5, %v6386_v46 }
0x1038   :  { %v6391_v33 = vmul.f32 0.044715, %v6381_v23  ;;  %v6389_v54 = vmul.f32 0.5, %v6381_v23 }
0x1039   :  { %v6394_v7 = vmul.f32 %v6392_v32, %v6386_v46 }
0x103a   :  { %v6393_v34 = vmul.f32 %v6391_v33, %v6381_v23 }
0x103b   :  { %v6396_v15 = vmul.f32 %v6394_v7, %v6386_v46 }
0x103c   :  { %v6395_v4 = vmul.f32 %v6393_v34, %v6381_v23 }
0x103d   :  { %v6398_v21 = vadd.f32 %v6396_v15, %v6386_v46 }
0x103e   :  { %v6397_v25 = vadd.f32 %v6395_v4, %v6381_v23 }
0x103f   :  { %v6400_v19 = vmul.f32 0.7978846, %v6398_v21 }
0x1040   :  { %v6399_v3 = vmul.f32 0.7978846, %v6397_v25 }
0x1041   :  { %7581 = vtanh.f32 %v6400_v19 }
0x1042   :  { %7583 = vtanh.f32 %v6399_v3 }
0x104b   :  { %v7582_v11 = vpop.eup %7581 }
0x104c   :  { %v7584_v35 = vpop.eup %7583  ;;  %v6404_v50 = vadd.f32 1.0, %v7582_v11 }
0x104d   :  { %v6403_v43 = vadd.f32 1.0, %v7584_v35 }
0x104e   :  { %v6406_v30 = vmul.f32 %v6404_v50, %v6390_v12 }
0x104f   :  { %v6405_v36 = vmul.f32 %v6403_v43, %v6389_v54 }
0x1051   :  { %7285 = vmatprep.mubr.msk.f32.mxu0 %vm6418_vm12, %v6405_v36 }
0x1052   :  { %7286 = vmatmul.mubr.msk.f32.vlgmr.msra.gmra.mrb[56].mxu0 %vm6418_vm12, %v6406_v30 }
0x1125   :  { %v7287_v27 = vpop.f32.mrb[56].mxu0 }
0x1126   :  { %v6509_v1 = vadd.f32 %v7287_v27, %v6729_v55  ;;  %v6503_v14 = vpop.f32.mrb[57].mxu0 }
0x1127   :  { %v6504_v39 = vadd.f32 %v6729_v55, %v6503_v14 }
0x1128   :  { %v6517_v31 = vmul.f32 %v6514_v44, %v6509_v1 }
0x1129   :  { %v6516_v0 = vmul.f32 %v6514_v44, %v6504_v39 }
0x112a   :  { %v6519_v16 = vadd.f32 %v6517_v31, %v8975_v10 }
0x112b   :  { %v6518_v26 = vadd.f32 %v6516_v0, %v8980_v60 }
0x112c   :  { %6521 = vst.msk [vmem:[#allocation2 + $0x8] sm:$0xff] %vm113_vm0, %v6519_v16 }
0x112d   :  { %6520 = vst.msk [vmem:[#allocation2] sm:$0xff] %vm113_vm0, %v6518_v26 }
0x112e   :  { %7598 = shalt.err (!%p7595_p4)
}
0x112f   :  { %s7599_s19 = scalar_lea.hbm %s9099_s17, 256 }
0x1130   :  { %p7600_p5 = scmp.ne.s32.totalorder %s9099_s17, %s7599_s19  ;;  %p7603_p6 = scmp.lt.u32.totalorder %s7599_s19, %s9099_s17 }
0x1132   :  { %p7605_p7 = pnand %p7603_p6, %p7600_p5 }
0x1134   :  { %7608 = shalt.err (!%p7605_p7)
}
0x1135   :  { %s7631_s5 = smov 128  }
0x1136   :  { %6533 = dma.vmem_to_hbm [thread:$0]  %s6528_s29, 256, %s9099_s17, [#allocation3], %s7631_s5, %s7631_s5, %s7626_s0  }
0x1137   :  { %7609 = dma.done.wait [#allocation3], 256  }
0x1138   :  { %7610 = vsyncadd [#allocation3], 4294967040 }
0x1139   :  { %6537 = vsyncpa [#allocation3], 1 }

</bundles_post_ra>
